<compile_context>
chip_gen: v6e
topology: v6e:2x2x1
jax: 0.10.0
libtpu: 0.0.40
codegen_flags: <defaults>
</compile_context>

<pallas_src>
import functools
import math

import jax
import jax.numpy as jnp
from jax.experimental import pallas as pl
from jax.experimental.pallas import tpu as pltpu


# ----------------------------------------------------------------------------
# Fused encoder-stack kernel: grid = (batch_blocks, num_layers)
# ----------------------------------------------------------------------------
def fused_encoder_kernel(x_ref, wqkv_ref, bqkv_ref, wo_ref, bo_ref,
                         ln1g_ref, ln1b_ref, w1_ref, b1_ref, w2_ref, b2_ref,
                         ln2g_ref, ln2b_ref,
                         o_ref, x_sc, *, num_heads):
    l = pl.program_id(1)
    num_layers = pl.num_programs(1)

    # Load this batch block into the resident VMEM scratch at the first layer.
    @pl.when(l == 0)
    def _():
        x_sc[...] = x_ref[...]

    x3 = x_sc[...]                              # (BN, S, E) f32
    bn, s_len, e_dim = x3.shape
    n_heads = num_heads
    dh = e_dim // n_heads
    scale = 1.0 / math.sqrt(dh)

    # --- self attention -------------------------------------------------------
    # Token-batched QKV projection: all BN*S tokens in one MXU matmul.
    xt = x3.reshape(bn * s_len, e_dim)          # free leading-dim merge
    qkv = jnp.dot(xt, wqkv_ref[0], preferred_element_type=jnp.float32)
    qkv = qkv + bqkv_ref[0]                     # (BN*S, 3E)
    q3 = qkv[:, 0 * e_dim:1 * e_dim].reshape(bn, s_len, e_dim)
    k3 = qkv[:, 1 * e_dim:2 * e_dim].reshape(bn, s_len, e_dim)
    v3 = qkv[:, 2 * e_dim:3 * e_dim].reshape(bn, s_len, e_dim)

    ctxs = []
    for hh in range(n_heads):                   # static head loop, batched over BN
        sl = slice(hh * dh, (hh + 1) * dh)
        qh = q3[:, :, sl]                       # (BN, S, Dh)
        kh = k3[:, :, sl]
        vh = v3[:, :, sl]
        sc = jnp.einsum('nqd,nkd->nqk', qh, kh,
                        preferred_element_type=jnp.float32) * scale
        sc = sc - jnp.max(sc, axis=-1, keepdims=True)
        p = jnp.exp(sc)
        p = p * pl.reciprocal(jnp.sum(p, axis=-1, keepdims=True), approx=True)
        ctxs.append(jnp.einsum('nqk,nkd->nqd', p, vh,
                               preferred_element_type=jnp.float32))
    ctx = jnp.concatenate(ctxs, axis=-1).reshape(bn * s_len, e_dim)

    attn = jnp.dot(ctx, wo_ref[0], preferred_element_type=jnp.float32)
    attn = attn + bo_ref[0]

    # --- residual + LayerNorm1 ------------------------------------------------
    h1 = xt + attn
    mu = jnp.mean(h1, axis=-1, keepdims=True)
    var = jnp.mean((h1 - mu) ** 2, axis=-1, keepdims=True)
    h1 = (h1 - mu) * jax.lax.rsqrt(var + 1e-5)
    h1 = h1 * ln1g_ref[0] + ln1b_ref[0]

    # --- feed-forward (ReLU) ----------------------------------------------------
    f = jnp.dot(h1, w1_ref[0], preferred_element_type=jnp.float32) + b1_ref[0]
    f = jnp.maximum(f, 0.0)
    f = jnp.dot(f, w2_ref[0], preferred_element_type=jnp.float32) + b2_ref[0]

    # --- residual + LayerNorm2 --------------------------------------------------
    h2 = h1 + f
    mu2 = jnp.mean(h2, axis=-1, keepdims=True)
    var2 = jnp.mean((h2 - mu2) ** 2, axis=-1, keepdims=True)
    out = (h2 - mu2) * jax.lax.rsqrt(var2 + 1e-5)
    out = out * ln2g_ref[0] + ln2b_ref[0]

    out3 = out.reshape(bn, s_len, e_dim)
    x_sc[...] = out3                            # carry to next layer (stays in VMEM)

    # Fused final mean over the sequence axis at the last layer.
    @pl.when(l == num_layers - 1)
    def _():
        o_ref[...] = jnp.mean(out3, axis=1).astype(o_ref.dtype)


def temporal_transformer(frame_features, params, num_heads):
    """frame_features: (S, N, E) as in PyTorch (batch_first=False).
    Returns (N, E) = transformer_encoder(x).mean(dim=0)."""
    x = jnp.transpose(frame_features, (1, 0, 2)).astype(jnp.float32)   # (N, S, E)
    n_batch, s_len, e_dim = x.shape
    num_layers = len(params)
    d_ff = params[0]["w1"].shape[-1]

    # Stack per-layer weights along a leading L axis so the pipeline can stream
    # them across the layer grid axis.  Biases / LN params become (L, 1, dim).
    stacked = {k: jnp.stack([p[k] for p in params]) for k in params[0]}

    # Batch block: everything at once for small N; keep a "parallel" axis so
    # large N can be split across v7x TensorCores.
    bn = n_batch if n_batch <= 8 else 8
    assert n_batch % bn == 0
    grid = (n_batch // bn, num_layers)

    layer_map = lambda b, l: (l, 0, 0)
    kernel = functools.partial(fused_encoder_kernel, num_heads=num_heads)

    return pl.pallas_call(
        kernel,
        out_shape=jax.ShapeDtypeStruct((n_batch, e_dim), jnp.float32),
        grid_spec=pltpu.PrefetchScalarGridSpec(
            num_scalar_prefetch=0,
            grid=grid,
            in_specs=[
                pl.BlockSpec((bn, s_len, e_dim), lambda b, l: (b, 0, 0)),  # x
                pl.BlockSpec((1, e_dim, 3 * e_dim), layer_map),            # Wqkv
                pl.BlockSpec((1, 1, 3 * e_dim), layer_map),                # bqkv
                pl.BlockSpec((1, e_dim, e_dim), layer_map),                # Wo
                pl.BlockSpec((1, 1, e_dim), layer_map),                    # bo
                pl.BlockSpec((1, 1, e_dim), layer_map),                    # ln1 gamma
                pl.BlockSpec((1, 1, e_dim), layer_map),                    # ln1 beta
                pl.BlockSpec((1, e_dim, d_ff), layer_map),                 # W1
                pl.BlockSpec((1, 1, d_ff), layer_map),                     # b1
                pl.BlockSpec((1, d_ff, e_dim), layer_map),                 # W2
                pl.BlockSpec((1, 1, e_dim), layer_map),                    # b2
                pl.BlockSpec((1, 1, e_dim), layer_map),                    # ln2 gamma
                pl.BlockSpec((1, 1, e_dim), layer_map),                    # ln2 beta
            ],
            out_specs=pl.BlockSpec((bn, e_dim), lambda b, l: (b, 0)),
            scratch_shapes=[pltpu.VMEM((bn, s_len, e_dim), jnp.float32)],
        ),
        compiler_params=pltpu.CompilerParams(
            dimension_semantics=("parallel", "arbitrary")),
    )(x, stacked["wqkv"], stacked["bqkv"], stacked["wo"], stacked["bo"],
      stacked["ln1_g"], stacked["ln1_b"], stacked["w1"], stacked["b1"],
      stacked["w2"], stacked["b2"], stacked["ln2_g"], stacked["ln2_b"])


# ----------------------------------------------------------------------------
# Parameter init (per-layer dicts; stacked inside the wrapper)
# ----------------------------------------------------------------------------
def init_params(key, num_layers, d_model, d_ff):
    params = []
    for layer in range(num_layers):
        k = jax.random.fold_in(key, layer)
        ks = jax.random.split(k, 4)
        scale = 0.02
        params.append(dict(
            wqkv=scale * jax.random.normal(ks[0], (d_model, 3 * d_model), jnp.float32),
            bqkv=jnp.zeros((1, 3 * d_model), jnp.float32),
            wo=scale * jax.random.normal(ks[1], (d_model, d_model), jnp.float32),
            bo=jnp.zeros((1, d_model), jnp.float32),
            ln1_g=jnp.ones((1, d_model), jnp.float32),
            ln1_b=jnp.zeros((1, d_model), jnp.float32),
            w1=scale * jax.random.normal(ks[2], (d_model, d_ff), jnp.float32),
            b1=jnp.zeros((1, d_ff), jnp.float32),
            w2=scale * jax.random.normal(ks[3], (d_ff, d_model), jnp.float32),
            b2=jnp.zeros((1, d_model), jnp.float32),
            ln2_g=jnp.ones((1, d_model), jnp.float32),
            ln2_b=jnp.zeros((1, d_model), jnp.float32),
        ))
    return params


# ----------------------------------------------------------------------------
# Pure-JAX reference (same math, same weights) for a sanity check.
# ----------------------------------------------------------------------------
def reference(frame_features, params, num_heads):
    x = jnp.transpose(frame_features, (1, 0, 2)).astype(jnp.float32)  # (N,S,E)
    N, S, E = x.shape
    H = num_heads
    Dh = E // H

    def ln(h, g, b):
        mu = jnp.mean(h, axis=-1, keepdims=True)
        var = jnp.mean((h - mu) ** 2, axis=-1, keepdims=True)
        return (h - mu) / jnp.sqrt(var + 1e-5) * g + b

    for p in params:
        qkv = x @ p["wqkv"] + p["bqkv"]
        q, k, v = qkv[..., :E], qkv[..., E:2 * E], qkv[..., 2 * E:]
        q = q.reshape(N, S, H, Dh).transpose(0, 2, 1, 3)
        k = k.reshape(N, S, H, Dh).transpose(0, 2, 1, 3)
        v = v.reshape(N, S, H, Dh).transpose(0, 2, 1, 3)
        s = jnp.einsum("nhsd,nhtd->nhst", q, k) / jnp.sqrt(jnp.float32(Dh))
        a = jax.nn.softmax(s, axis=-1)
        ctx = jnp.einsum("nhst,nhtd->nhsd", a, v).transpose(0, 2, 1, 3).reshape(N, S, E)
        attn = ctx @ p["wo"] + p["bo"]
        h1 = ln(x + attn, p["ln1_g"], p["ln1_b"])
        f = jnp.maximum(h1 @ p["w1"] + p["b1"], 0.0) @ p["w2"] + p["b2"]
        x = ln(h1 + f, p["ln2_g"], p["ln2_b"])
    return jnp.mean(x, axis=1)


if __name__ == "__main__":
    # Small, MXU/vreg-friendly shapes consistent with the module's forward:
    # frame_features is (seq, batch, d_model); d_model divisible by num_heads
    # and by 128 (lane width).
    S, N, E = 8, 2, 128
    NUM_HEADS = 8
    NUM_LAYERS = 4
    D_FF = 256   # scaled down from PyTorch default dim_feedforward=2048

    key = jax.random.PRNGKey(0)
    k_x, k_p = jax.random.split(key)
    frame_features = jax.random.normal(k_x, (S, N, E), jnp.float32)
    params = init_params(k_p, NUM_LAYERS, E, D_FF)

    out = temporal_transformer(frame_features, params, NUM_HEADS)
    out = jax.block_until_ready(out)

    assert out.shape == (N, E), out.shape
    assert bool(jnp.all(jnp.isfinite(out)))

    ref = jax.block_until_ready(reference(frame_features, params, NUM_HEADS))
    assert jnp.allclose(out, ref, atol=2e-2, rtol=2e-2), (
        float(jnp.max(jnp.abs(out - ref))))

    print("KERNEL_OK")
</pallas_src>

<mosaic_0001>
module attributes {stable_mosaic.version = 11 : i64} {
  func.func @fused_encoder_kernel(%arg0: i32, %arg1: i32, %arg2: memref<2x8x128xf32, #tpu.memory_space<vmem>>, %arg3: memref<1x128x384xf32, #tpu.memory_space<vmem>>, %arg4: memref<1x1x384xf32, #tpu.memory_space<vmem>>, %arg5: memref<1x128x128xf32, #tpu.memory_space<vmem>>, %arg6: memref<1x1x128xf32, #tpu.memory_space<vmem>>, %arg7: memref<1x1x128xf32, #tpu.memory_space<vmem>>, %arg8: memref<1x1x128xf32, #tpu.memory_space<vmem>>, %arg9: memref<1x128x256xf32, #tpu.memory_space<vmem>>, %arg10: memref<1x1x256xf32, #tpu.memory_space<vmem>>, %arg11: memref<1x256x128xf32, #tpu.memory_space<vmem>>, %arg12: memref<1x1x128xf32, #tpu.memory_space<vmem>>, %arg13: memref<1x1x128xf32, #tpu.memory_space<vmem>>, %arg14: memref<1x1x128xf32, #tpu.memory_space<vmem>>, %arg15: memref<2x128xf32, #tpu.memory_space<vmem>>, %arg16: memref<2x8x128xf32, #tpu.memory_space<vmem>>) attributes {dimension_semantics = [#tpu.dimension_semantics<parallel>, #tpu.dimension_semantics<arbitrary>], iteration_bounds = array<i64: 1, 4>, scalar_prefetch = 0 : i64, scratch_operands = 1 : i64, tpu.core_type = #tpu.core_type<tc>, window_params = [{transform_indices = @transform_0, window_bounds = array<i64: 2, 8, 128>}, {transform_indices = @transform_1, window_bounds = array<i64: 1, 128, 384>}, {transform_indices = @transform_2, window_bounds = array<i64: 1, 1, 384>}, {transform_indices = @transform_3, window_bounds = array<i64: 1, 128, 128>}, {transform_indices = @transform_4, window_bounds = array<i64: 1, 1, 128>}, {transform_indices = @transform_5, window_bounds = array<i64: 1, 1, 128>}, {transform_indices = @transform_6, window_bounds = array<i64: 1, 1, 128>}, {transform_indices = @transform_7, window_bounds = array<i64: 1, 128, 256>}, {transform_indices = @transform_8, window_bounds = array<i64: 1, 1, 256>}, {transform_indices = @transform_9, window_bounds = array<i64: 1, 256, 128>}, {transform_indices = @transform_10, window_bounds = array<i64: 1, 1, 128>}, {transform_indices = @transform_11, window_bounds = array<i64: 1, 1, 128>}, {transform_indices = @transform_12, window_bounds = array<i64: 1, 1, 128>}, {transform_indices = @transform_13, window_bounds = array<i64: 2, 128>}]} {
    %c0_i32 = arith.constant 0 : i32
    %0 = arith.cmpi eq, %arg1, %c0_i32 : i32
    %1 = arith.extui %0 : i1 to i32
    %c0_i32_0 = arith.constant 0 : i32
    %2 = arith.cmpi ne, %1, %c0_i32_0 : i32
    scf.if %2 {
      %c0_97 = arith.constant 0 : index
      %c0_98 = arith.constant 0 : index
      %c0_99 = arith.constant 0 : index
      %238 = vector.load %arg2[%c0_97, %c0_98, %c0_99] : memref<2x8x128xf32, #tpu.memory_space<vmem>>, vector<2x8x128xf32>
      %c0_100 = arith.constant 0 : index
      %c0_101 = arith.constant 0 : index
      %c0_102 = arith.constant 0 : index
      %239 = vector.load %arg16[%c0_100, %c0_101, %c0_102] : memref<2x8x128xf32, #tpu.memory_space<vmem>>, vector<2x8x128xf32>
      tpu.vector_store %arg16[%c0_100, %c0_101, %c0_102], %238 {strides = array<i32>} : memref<2x8x128xf32, #tpu.memory_space<vmem>>, vector<2x8x128xf32>,
    } else {
    }
    %c0 = arith.constant 0 : index
    %c0_1 = arith.constant 0 : index
    %c0_2 = arith.constant 0 : index
    %3 = vector.load %arg16[%c0, %c0_1, %c0_2] : memref<2x8x128xf32, #tpu.memory_space<vmem>>, vector<2x8x128xf32>
    %4 = vector.shape_cast %3 : vector<2x8x128xf32> to vector<16x128xf32>
    %c0_3 = arith.constant 0 : index
    %c0_4 = arith.constant 0 : index
    %c0_5 = arith.constant 0 : index
    %5 = vector.load %arg3[%c0_3, %c0_4, %c0_5] : memref<1x128x384xf32, #tpu.memory_space<vmem>>, vector<1x128x384xf32>
    %6 = vector.shape_cast %5 : vector<1x128x384xf32> to vector<128x384xf32>
    %cst = arith.constant dense<0.000000e+00> : vector<16x384xf32>
    %7 = tpu.matmul %4, %6, %cst {dimension_numbers = #tpu.dot_dimension_numbers<[1], [0], [0], [1], [0, 0, 1, 1], [], []>} : vector<16x128xf32>, vector<128x384xf32>, vector<16x384xf32> -> vector<16x384xf32>
    %c0_6 = arith.constant 0 : index
    %c0_7 = arith.constant 0 : index
    %c0_8 = arith.constant 0 : index
    %8 = vector.load %arg4[%c0_6, %c0_7, %c0_8] : memref<1x1x384xf32, #tpu.memory_space<vmem>>, vector<1x1x384xf32>
    %9 = vector.shape_cast %8 : vector<1x1x384xf32> to vector<1x384xf32>
    %10 = vector.broadcast %9 : vector<1x384xf32> to vector<16x384xf32>
    %11 = arith.addf %7, %10 : vector<16x384xf32>
    %12 = vector.extract_strided_slice %11 {offsets = [0, 0], sizes = [16, 128], strides = [1, 1]} : vector<16x384xf32> to vector<16x128xf32>
    %13 = vector.shape_cast %12 : vector<16x128xf32> to vector<2x8x128xf32>
    %14 = vector.extract_strided_slice %11 {offsets = [0, 128], sizes = [16, 128], strides = [1, 1]} : vector<16x384xf32> to vector<16x128xf32>
    %15 = vector.shape_cast %14 : vector<16x128xf32> to vector<2x8x128xf32>
    %16 = vector.extract_strided_slice %11 {offsets = [0, 256], sizes = [16, 128], strides = [1, 1]} : vector<16x384xf32> to vector<16x128xf32>
    %17 = vector.shape_cast %16 : vector<16x128xf32> to vector<2x8x128xf32>
    %18 = vector.extract_strided_slice %13 {offsets = [0, 0, 0], sizes = [2, 8, 16], strides = [1, 1, 1]} : vector<2x8x128xf32> to vector<2x8x16xf32>
    %19 = vector.extract_strided_slice %15 {offsets = [0, 0, 0], sizes = [2, 8, 16], strides = [1, 1, 1]} : vector<2x8x128xf32> to vector<2x8x16xf32>
    %20 = vector.extract_strided_slice %17 {offsets = [0, 0, 0], sizes = [2, 8, 16], strides = [1, 1, 1]} : vector<2x8x128xf32> to vector<2x8x16xf32>
    "tpu.trace_start"() <{level = 10 : i32, message = "nqd,nkd->nqk"}> : () -> ()
    %cst_9 = arith.constant dense<0.000000e+00> : vector<2x8x8xf32>
    %21 = tpu.matmul %18, %19, %cst_9 {dimension_numbers = #tpu.dot_dimension_numbers<[2], [2], [1], [1], [0, 0, 0, 1, 1, 1], [0], [0]>} : vector<2x8x16xf32>, vector<2x8x16xf32>, vector<2x8x8xf32> -> vector<2x8x8xf32>
    "tpu.trace_stop"() : () -> ()
    %cst_10 = arith.constant 2.500000e-01 : f32
    %22 = vector.broadcast %cst_10 : f32 to vector<2x8x8xf32>
    %23 = arith.mulf %21, %22 : vector<2x8x8xf32>
    %cst_11 = arith.constant dense<0xFF800000> : vector<2x8xf32>
    %24 = vector.multi_reduction <maximumf>, %23, %cst_11 [2] : vector<2x8x8xf32> to vector<2x8xf32>
    %25 = vector.shape_cast %24 : vector<2x8xf32> to vector<2x8x1xf32>
    %26 = vector.broadcast %25 : vector<2x8x1xf32> to vector<2x8x8xf32>
    %27 = arith.subf %23, %26 : vector<2x8x8xf32>
    %28 = math.exp %27 : vector<2x8x8xf32>
    %cst_12 = arith.constant dense<0.000000e+00> : vector<2x8xf32>
    %29 = vector.multi_reduction <add>, %28, %cst_12 [2] : vector<2x8x8xf32> to vector<2x8xf32>
    %30 = vector.shape_cast %29 : vector<2x8xf32> to vector<2x8x1xf32>
    %31 = tpu.reciprocal %30 {approx = true} : vector<2x8x1xf32> -> vector<2x8x1xf32>
    %32 = vector.broadcast %31 : vector<2x8x1xf32> to vector<2x8x8xf32>
    %33 = arith.mulf %28, %32 : vector<2x8x8xf32>
    "tpu.trace_start"() <{level = 10 : i32, message = "nqk,nkd->nqd"}> : () -> ()
    %cst_13 = arith.constant dense<0.000000e+00> : vector<2x8x16xf32>
    %34 = tpu.matmul %33, %20, %cst_13 {dimension_numbers = #tpu.dot_dimension_numbers<[2], [1], [1], [2], [0, 0, 0, 1, 1, 2], [0], [0]>} : vector<2x8x8xf32>, vector<2x8x16xf32>, vector<2x8x16xf32> -> vector<2x8x16xf32>
    "tpu.trace_stop"() : () -> ()
    %35 = vector.extract_strided_slice %13 {offsets = [0, 0, 16], sizes = [2, 8, 16], strides = [1, 1, 1]} : vector<2x8x128xf32> to vector<2x8x16xf32>
    %36 = vector.extract_strided_slice %15 {offsets = [0, 0, 16], sizes = [2, 8, 16], strides = [1, 1, 1]} : vector<2x8x128xf32> to vector<2x8x16xf32>
    %37 = vector.extract_strided_slice %17 {offsets = [0, 0, 16], sizes = [2, 8, 16], strides = [1, 1, 1]} : vector<2x8x128xf32> to vector<2x8x16xf32>
    "tpu.trace_start"() <{level = 10 : i32, message = "nqd,nkd->nqk"}> : () -> ()
    %cst_14 = arith.constant dense<0.000000e+00> : vector<2x8x8xf32>
    %38 = tpu.matmul %35, %36, %cst_14 {dimension_numbers = #tpu.dot_dimension_numbers<[2], [2], [1], [1], [0, 0, 0, 1, 1, 1], [0], [0]>} : vector<2x8x16xf32>, vector<2x8x16xf32>, vector<2x8x8xf32> -> vector<2x8x8xf32>
    "tpu.trace_stop"() : () -> ()
    %cst_15 = arith.constant 2.500000e-01 : f32
    %39 = vector.broadcast %cst_15 : f32 to vector<2x8x8xf32>
    %40 = arith.mulf %38, %39 : vector<2x8x8xf32>
    %cst_16 = arith.constant dense<0xFF800000> : vector<2x8xf32>
    %41 = vector.multi_reduction <maximumf>, %40, %cst_16 [2] : vector<2x8x8xf32> to vector<2x8xf32>
    %42 = vector.shape_cast %41 : vector<2x8xf32> to vector<2x8x1xf32>
    %43 = vector.broadcast %42 : vector<2x8x1xf32> to vector<2x8x8xf32>
    %44 = arith.subf %40, %43 : vector<2x8x8xf32>
    %45 = math.exp %44 : vector<2x8x8xf32>
    %cst_17 = arith.constant dense<0.000000e+00> : vector<2x8xf32>
    %46 = vector.multi_reduction <add>, %45, %cst_17 [2] : vector<2x8x8xf32> to vector<2x8xf32>
    %47 = vector.shape_cast %46 : vector<2x8xf32> to vector<2x8x1xf32>
    %48 = tpu.reciprocal %47 {approx = true} : vector<2x8x1xf32> -> vector<2x8x1xf32>
    %49 = vector.broadcast %48 : vector<2x8x1xf32> to vector<2x8x8xf32>
    %50 = arith.mulf %45, %49 : vector<2x8x8xf32>
    "tpu.trace_start"() <{level = 10 : i32, message = "nqk,nkd->nqd"}> : () -> ()
    %cst_18 = arith.constant dense<0.000000e+00> : vector<2x8x16xf32>
    %51 = tpu.matmul %50, %37, %cst_18 {dimension_numbers = #tpu.dot_dimension_numbers<[2], [1], [1], [2], [0, 0, 0, 1, 1, 2], [0], [0]>} : vector<2x8x8xf32>, vector<2x8x16xf32>, vector<2x8x16xf32> -> vector<2x8x16xf32>
    "tpu.trace_stop"() : () -> ()
    %52 = vector.extract_strided_slice %13 {offsets = [0, 0, 32], sizes = [2, 8, 16], strides = [1, 1, 1]} : vector<2x8x128xf32> to vector<2x8x16xf32>
    %53 = vector.extract_strided_slice %15 {offsets = [0, 0, 32], sizes = [2, 8, 16], strides = [1, 1, 1]} : vector<2x8x128xf32> to vector<2x8x16xf32>
    %54 = vector.extract_strided_slice %17 {offsets = [0, 0, 32], sizes = [2, 8, 16], strides = [1, 1, 1]} : vector<2x8x128xf32> to vector<2x8x16xf32>
    "tpu.trace_start"() <{level = 10 : i32, message = "nqd,nkd->nqk"}> : () -> ()
    %cst_19 = arith.constant dense<0.000000e+00> : vector<2x8x8xf32>
    %55 = tpu.matmul %52, %53, %cst_19 {dimension_numbers = #tpu.dot_dimension_numbers<[2], [2], [1], [1], [0, 0, 0, 1, 1, 1], [0], [0]>} : vector<2x8x16xf32>, vector<2x8x16xf32>, vector<2x8x8xf32> -> vector<2x8x8xf32>
    "tpu.trace_stop"() : () -> ()
    %cst_20 = arith.constant 2.500000e-01 : f32
    %56 = vector.broadcast %cst_20 : f32 to vector<2x8x8xf32>
    %57 = arith.mulf %55, %56 : vector<2x8x8xf32>
    %cst_21 = arith.constant dense<0xFF800000> : vector<2x8xf32>
    %58 = vector.multi_reduction <maximumf>, %57, %cst_21 [2] : vector<2x8x8xf32> to vector<2x8xf32>
    %59 = vector.shape_cast %58 : vector<2x8xf32> to vector<2x8x1xf32>
    %60 = vector.broadcast %59 : vector<2x8x1xf32> to vector<2x8x8xf32>
    %61 = arith.subf %57, %60 : vector<2x8x8xf32>
    %62 = math.exp %61 : vector<2x8x8xf32>
    %cst_22 = arith.constant dense<0.000000e+00> : vector<2x8xf32>
    %63 = vector.multi_reduction <add>, %62, %cst_22 [2] : vector<2x8x8xf32> to vector<2x8xf32>
    %64 = vector.shape_cast %63 : vector<2x8xf32> to vector<2x8x1xf32>
    %65 = tpu.reciprocal %64 {approx = true} : vector<2x8x1xf32> -> vector<2x8x1xf32>
    %66 = vector.broadcast %65 : vector<2x8x1xf32> to vector<2x8x8xf32>
    %67 = arith.mulf %62, %66 : vector<2x8x8xf32>
    "tpu.trace_start"() <{level = 10 : i32, message = "nqk,nkd->nqd"}> : () -> ()
    %cst_23 = arith.constant dense<0.000000e+00> : vector<2x8x16xf32>
    %68 = tpu.matmul %67, %54, %cst_23 {dimension_numbers = #tpu.dot_dimension_numbers<[2], [1], [1], [2], [0, 0, 0, 1, 1, 2], [0], [0]>} : vector<2x8x8xf32>, vector<2x8x16xf32>, vector<2x8x16xf32> -> vector<2x8x16xf32>
    "tpu.trace_stop"() : () -> ()
    %69 = vector.extract_strided_slice %13 {offsets = [0, 0, 48], sizes = [2, 8, 16], strides = [1, 1, 1]} : vector<2x8x128xf32> to vector<2x8x16xf32>
    %70 = vector.extract_strided_slice %15 {offsets = [0, 0, 48], sizes = [2, 8, 16], strides = [1, 1, 1]} : vector<2x8x128xf32> to vector<2x8x16xf32>
    %71 = vector.extract_strided_slice %17 {offsets = [0, 0, 48], sizes = [2, 8, 16], strides = [1, 1, 1]} : vector<2x8x128xf32> to vector<2x8x16xf32>
    "tpu.trace_start"() <{level = 10 : i32, message = "nqd,nkd->nqk"}> : () -> ()
    %cst_24 = arith.constant dense<0.000000e+00> : vector<2x8x8xf32>
    %72 = tpu.matmul %69, %70, %cst_24 {dimension_numbers = #tpu.dot_dimension_numbers<[2], [2], [1], [1], [0, 0, 0, 1, 1, 1], [0], [0]>} : vector<2x8x16xf32>, vector<2x8x16xf32>, vector<2x8x8xf32> -> vector<2x8x8xf32>
    "tpu.trace_stop"() : () -> ()
    %cst_25 = arith.constant 2.500000e-01 : f32
    %73 = vector.broadcast %cst_25 : f32 to vector<2x8x8xf32>
    %74 = arith.mulf %72, %73 : vector<2x8x8xf32>
    %cst_26 = arith.constant dense<0xFF800000> : vector<2x8xf32>
    %75 = vector.multi_reduction <maximumf>, %74, %cst_26 [2] : vector<2x8x8xf32> to vector<2x8xf32>
    %76 = vector.shape_cast %75 : vector<2x8xf32> to vector<2x8x1xf32>
    %77 = vector.broadcast %76 : vector<2x8x1xf32> to vector<2x8x8xf32>
    %78 = arith.subf %74, %77 : vector<2x8x8xf32>
    %79 = math.exp %78 : vector<2x8x8xf32>
    %cst_27 = arith.constant dense<0.000000e+00> : vector<2x8xf32>
    %80 = vector.multi_reduction <add>, %79, %cst_27 [2] : vector<2x8x8xf32> to vector<2x8xf32>
    %81 = vector.shape_cast %80 : vector<2x8xf32> to vector<2x8x1xf32>
    %82 = tpu.reciprocal %81 {approx = true} : vector<2x8x1xf32> -> vector<2x8x1xf32>
    %83 = vector.broadcast %82 : vector<2x8x1xf32> to vector<2x8x8xf32>
    %84 = arith.mulf %79, %83 : vector<2x8x8xf32>
    "tpu.trace_start"() <{level = 10 : i32, message = "nqk,nkd->nqd"}> : () -> ()
    %cst_28 = arith.constant dense<0.000000e+00> : vector<2x8x16xf32>
    %85 = tpu.matmul %84, %71, %cst_28 {dimension_numbers = #tpu.dot_dimension_numbers<[2], [1], [1], [2], [0, 0, 0, 1, 1, 2], [0], [0]>} : vector<2x8x8xf32>, vector<2x8x16xf32>, vector<2x8x16xf32> -> vector<2x8x16xf32>
    "tpu.trace_stop"() : () -> ()
    %86 = vector.extract_strided_slice %13 {offsets = [0, 0, 64], sizes = [2, 8, 16], strides = [1, 1, 1]} : vector<2x8x128xf32> to vector<2x8x16xf32>
    %87 = vector.extract_strided_slice %15 {offsets = [0, 0, 64], sizes = [2, 8, 16], strides = [1, 1, 1]} : vector<2x8x128xf32> to vector<2x8x16xf32>
    %88 = vector.extract_strided_slice %17 {offsets = [0, 0, 64], sizes = [2, 8, 16], strides = [1, 1, 1]} : vector<2x8x128xf32> to vector<2x8x16xf32>
    "tpu.trace_start"() <{level = 10 : i32, message = "nqd,nkd->nqk"}> : () -> ()
    %cst_29 = arith.constant dense<0.000000e+00> : vector<2x8x8xf32>
    %89 = tpu.matmul %86, %87, %cst_29 {dimension_numbers = #tpu.dot_dimension_numbers<[2], [2], [1], [1], [0, 0, 0, 1, 1, 1], [0], [0]>} : vector<2x8x16xf32>, vector<2x8x16xf32>, vector<2x8x8xf32> -> vector<2x8x8xf32>
    "tpu.trace_stop"() : () -> ()
    %cst_30 = arith.constant 2.500000e-01 : f32
    %90 = vector.broadcast %cst_30 : f32 to vector<2x8x8xf32>
    %91 = arith.mulf %89, %90 : vector<2x8x8xf32>
    %cst_31 = arith.constant dense<0xFF800000> : vector<2x8xf32>
    %92 = vector.multi_reduction <maximumf>, %91, %cst_31 [2] : vector<2x8x8xf32> to vector<2x8xf32>
    %93 = vector.shape_cast %92 : vector<2x8xf32> to vector<2x8x1xf32>
    %94 = vector.broadcast %93 : vector<2x8x1xf32> to vector<2x8x8xf32>
    %95 = arith.subf %91, %94 : vector<2x8x8xf32>
    %96 = math.exp %95 : vector<2x8x8xf32>
    %cst_32 = arith.constant dense<0.000000e+00> : vector<2x8xf32>
    %97 = vector.multi_reduction <add>, %96, %cst_32 [2] : vector<2x8x8xf32> to vector<2x8xf32>
    %98 = vector.shape_cast %97 : vector<2x8xf32> to vector<2x8x1xf32>
    %99 = tpu.reciprocal %98 {approx = true} : vector<2x8x1xf32> -> vector<2x8x1xf32>
    %100 = vector.broadcast %99 : vector<2x8x1xf32> to vector<2x8x8xf32>
    %101 = arith.mulf %96, %100 : vector<2x8x8xf32>
    "tpu.trace_start"() <{level = 10 : i32, message = "nqk,nkd->nqd"}> : () -> ()
    %cst_33 = arith.constant dense<0.000000e+00> : vector<2x8x16xf32>
    %102 = tpu.matmul %101, %88, %cst_33 {dimension_numbers = #tpu.dot_dimension_numbers<[2], [1], [1], [2], [0, 0, 0, 1, 1, 2], [0], [0]>} : vector<2x8x8xf32>, vector<2x8x16xf32>, vector<2x8x16xf32> -> vector<2x8x16xf32>
    "tpu.trace_stop"() : () -> ()
    %103 = vector.extract_strided_slice %13 {offsets = [0, 0, 80], sizes = [2, 8, 16], strides = [1, 1, 1]} : vector<2x8x128xf32> to vector<2x8x16xf32>
    %104 = vector.extract_strided_slice %15 {offsets = [0, 0, 80], sizes = [2, 8, 16], strides = [1, 1, 1]} : vector<2x8x128xf32> to vector<2x8x16xf32>
    %105 = vector.extract_strided_slice %17 {offsets = [0, 0, 80], sizes = [2, 8, 16], strides = [1, 1, 1]} : vector<2x8x128xf32> to vector<2x8x16xf32>
    "tpu.trace_start"() <{level = 10 : i32, message = "nqd,nkd->nqk"}> : () -> ()
    %cst_34 = arith.constant dense<0.000000e+00> : vector<2x8x8xf32>
    %106 = tpu.matmul %103, %104, %cst_34 {dimension_numbers = #tpu.dot_dimension_numbers<[2], [2], [1], [1], [0, 0, 0, 1, 1, 1], [0], [0]>} : vector<2x8x16xf32>, vector<2x8x16xf32>, vector<2x8x8xf32> -> vector<2x8x8xf32>
    "tpu.trace_stop"() : () -> ()
    %cst_35 = arith.constant 2.500000e-01 : f32
    %107 = vector.broadcast %cst_35 : f32 to vector<2x8x8xf32>
    %108 = arith.mulf %106, %107 : vector<2x8x8xf32>
    %cst_36 = arith.constant dense<0xFF800000> : vector<2x8xf32>
    %109 = vector.multi_reduction <maximumf>, %108, %cst_36 [2] : vector<2x8x8xf32> to vector<2x8xf32>
    %110 = vector.shape_cast %109 : vector<2x8xf32> to vector<2x8x1xf32>
    %111 = vector.broadcast %110 : vector<2x8x1xf32> to vector<2x8x8xf32>
    %112 = arith.subf %108, %111 : vector<2x8x8xf32>
    %113 = math.exp %112 : vector<2x8x8xf32>
    %cst_37 = arith.constant dense<0.000000e+00> : vector<2x8xf32>
    %114 = vector.multi_reduction <add>, %113, %cst_37 [2] : vector<2x8x8xf32> to vector<2x8xf32>
    %115 = vector.shape_cast %114 : vector<2x8xf32> to vector<2x8x1xf32>
    %116 = tpu.reciprocal %115 {approx = true} : vector<2x8x1xf32> -> vector<2x8x1xf32>
    %117 = vector.broadcast %116 : vector<2x8x1xf32> to vector<2x8x8xf32>
    %118 = arith.mulf %113, %117 : vector<2x8x8xf32>
    "tpu.trace_start"() <{level = 10 : i32, message = "nqk,nkd->nqd"}> : () -> ()
    %cst_38 = arith.constant dense<0.000000e+00> : vector<2x8x16xf32>
    %119 = tpu.matmul %118, %105, %cst_38 {dimension_numbers = #tpu.dot_dimension_numbers<[2], [1], [1], [2], [0, 0, 0, 1, 1, 2], [0], [0]>} : vector<2x8x8xf32>, vector<2x8x16xf32>, vector<2x8x16xf32> -> vector<2x8x16xf32>
    "tpu.trace_stop"() : () -> ()
    %120 = vector.extract_strided_slice %13 {offsets = [0, 0, 96], sizes = [2, 8, 16], strides = [1, 1, 1]} : vector<2x8x128xf32> to vector<2x8x16xf32>
    %121 = vector.extract_strided_slice %15 {offsets = [0, 0, 96], sizes = [2, 8, 16], strides = [1, 1, 1]} : vector<2x8x128xf32> to vector<2x8x16xf32>
    %122 = vector.extract_strided_slice %17 {offsets = [0, 0, 96], sizes = [2, 8, 16], strides = [1, 1, 1]} : vector<2x8x128xf32> to vector<2x8x16xf32>
    "tpu.trace_start"() <{level = 10 : i32, message = "nqd,nkd->nqk"}> : () -> ()
    %cst_39 = arith.constant dense<0.000000e+00> : vector<2x8x8xf32>
    %123 = tpu.matmul %120, %121, %cst_39 {dimension_numbers = #tpu.dot_dimension_numbers<[2], [2], [1], [1], [0, 0, 0, 1, 1, 1], [0], [0]>} : vector<2x8x16xf32>, vector<2x8x16xf32>, vector<2x8x8xf32> -> vector<2x8x8xf32>
    "tpu.trace_stop"() : () -> ()
    %cst_40 = arith.constant 2.500000e-01 : f32
    %124 = vector.broadcast %cst_40 : f32 to vector<2x8x8xf32>
    %125 = arith.mulf %123, %124 : vector<2x8x8xf32>
    %cst_41 = arith.constant dense<0xFF800000> : vector<2x8xf32>
    %126 = vector.multi_reduction <maximumf>, %125, %cst_41 [2] : vector<2x8x8xf32> to vector<2x8xf32>
    %127 = vector.shape_cast %126 : vector<2x8xf32> to vector<2x8x1xf32>
    %128 = vector.broadcast %127 : vector<2x8x1xf32> to vector<2x8x8xf32>
    %129 = arith.subf %125, %128 : vector<2x8x8xf32>
    %130 = math.exp %129 : vector<2x8x8xf32>
    %cst_42 = arith.constant dense<0.000000e+00> : vector<2x8xf32>
    %131 = vector.multi_reduction <add>, %130, %cst_42 [2] : vector<2x8x8xf32> to vector<2x8xf32>
    %132 = vector.shape_cast %131 : vector<2x8xf32> to vector<2x8x1xf32>
    %133 = tpu.reciprocal %132 {approx = true} : vector<2x8x1xf32> -> vector<2x8x1xf32>
    %134 = vector.broadcast %133 : vector<2x8x1xf32> to vector<2x8x8xf32>
    %135 = arith.mulf %130, %134 : vector<2x8x8xf32>
    "tpu.trace_start"() <{level = 10 : i32, message = "nqk,nkd->nqd"}> : () -> ()
    %cst_43 = arith.constant dense<0.000000e+00> : vector<2x8x16xf32>
    %136 = tpu.matmul %135, %122, %cst_43 {dimension_numbers = #tpu.dot_dimension_numbers<[2], [1], [1], [2], [0, 0, 0, 1, 1, 2], [0], [0]>} : vector<2x8x8xf32>, vector<2x8x16xf32>, vector<2x8x16xf32> -> vector<2x8x16xf32>
    "tpu.trace_stop"() : () -> ()
    %137 = vector.extract_strided_slice %13 {offsets = [0, 0, 112], sizes = [2, 8, 16], strides = [1, 1, 1]} : vector<2x8x128xf32> to vector<2x8x16xf32>
    %138 = vector.extract_strided_slice %15 {offsets = [0, 0, 112], sizes = [2, 8, 16], strides = [1, 1, 1]} : vector<2x8x128xf32> to vector<2x8x16xf32>
    %139 = vector.extract_strided_slice %17 {offsets = [0, 0, 112], sizes = [2, 8, 16], strides = [1, 1, 1]} : vector<2x8x128xf32> to vector<2x8x16xf32>
    "tpu.trace_start"() <{level = 10 : i32, message = "nqd,nkd->nqk"}> : () -> ()
    %cst_44 = arith.constant dense<0.000000e+00> : vector<2x8x8xf32>
    %140 = tpu.matmul %137, %138, %cst_44 {dimension_numbers = #tpu.dot_dimension_numbers<[2], [2], [1], [1], [0, 0, 0, 1, 1, 1], [0], [0]>} : vector<2x8x16xf32>, vector<2x8x16xf32>, vector<2x8x8xf32> -> vector<2x8x8xf32>
    "tpu.trace_stop"() : () -> ()
    %cst_45 = arith.constant 2.500000e-01 : f32
    %141 = vector.broadcast %cst_45 : f32 to vector<2x8x8xf32>
    %142 = arith.mulf %140, %141 : vector<2x8x8xf32>
    %cst_46 = arith.constant dense<0xFF800000> : vector<2x8xf32>
    %143 = vector.multi_reduction <maximumf>, %142, %cst_46 [2] : vector<2x8x8xf32> to vector<2x8xf32>
    %144 = vector.shape_cast %143 : vector<2x8xf32> to vector<2x8x1xf32>
    %145 = vector.broadcast %144 : vector<2x8x1xf32> to vector<2x8x8xf32>
    %146 = arith.subf %142, %145 : vector<2x8x8xf32>
    %147 = math.exp %146 : vector<2x8x8xf32>
    %cst_47 = arith.constant dense<0.000000e+00> : vector<2x8xf32>
    %148 = vector.multi_reduction <add>, %147, %cst_47 [2] : vector<2x8x8xf32> to vector<2x8xf32>
    %149 = vector.shape_cast %148 : vector<2x8xf32> to vector<2x8x1xf32>
    %150 = tpu.reciprocal %149 {approx = true} : vector<2x8x1xf32> -> vector<2x8x1xf32>
    %151 = vector.broadcast %150 : vector<2x8x1xf32> to vector<2x8x8xf32>
    %152 = arith.mulf %147, %151 : vector<2x8x8xf32>
    "tpu.trace_start"() <{level = 10 : i32, message = "nqk,nkd->nqd"}> : () -> ()
    %cst_48 = arith.constant dense<0.000000e+00> : vector<2x8x16xf32>
    %153 = tpu.matmul %152, %139, %cst_48 {dimension_numbers = #tpu.dot_dimension_numbers<[2], [1], [1], [2], [0, 0, 0, 1, 1, 2], [0], [0]>} : vector<2x8x8xf32>, vector<2x8x16xf32>, vector<2x8x16xf32> -> vector<2x8x16xf32>
    "tpu.trace_stop"() : () -> ()
    %154 = tpu.concatenate %34, %51, %68, %85, %102, %119, %136, %153 in 2 : vector<2x8x16xf32>, vector<2x8x16xf32>, vector<2x8x16xf32>, vector<2x8x16xf32>, vector<2x8x16xf32>, vector<2x8x16xf32>, vector<2x8x16xf32>, vector<2x8x16xf32> -> vector<2x8x128xf32>
    %155 = vector.shape_cast %154 : vector<2x8x128xf32> to vector<16x128xf32>
    %c0_49 = arith.constant 0 : index
    %c0_50 = arith.constant 0 : index
    %c0_51 = arith.constant 0 : index
    %156 = vector.load %arg5[%c0_49, %c0_50, %c0_51] : memref<1x128x128xf32, #tpu.memory_space<vmem>>, vector<1x128x128xf32>
    %157 = vector.shape_cast %156 : vector<1x128x128xf32> to vector<128x128xf32>
    %cst_52 = arith.constant dense<0.000000e+00> : vector<16x128xf32>
    %158 = tpu.matmul %155, %157, %cst_52 {dimension_numbers = #tpu.dot_dimension_numbers<[1], [0], [0], [1], [0, 0, 1, 1], [], []>} : vector<16x128xf32>, vector<128x128xf32>, vector<16x128xf32> -> vector<16x128xf32>
    %c0_53 = arith.constant 0 : index
    %c0_54 = arith.constant 0 : index
    %c0_55 = arith.constant 0 : index
    %159 = vector.load %arg6[%c0_53, %c0_54, %c0_55] : memref<1x1x128xf32, #tpu.memory_space<vmem>>, vector<1x1x128xf32>
    %160 = vector.shape_cast %159 : vector<1x1x128xf32> to vector<1x128xf32>
    %161 = vector.broadcast %160 : vector<1x128xf32> to vector<16x128xf32>
    %162 = arith.addf %158, %161 : vector<16x128xf32>
    %163 = arith.addf %4, %162 : vector<16x128xf32>
    %cst_56 = arith.constant dense<0.000000e+00> : vector<16xf32>
    %164 = vector.multi_reduction <add>, %163, %cst_56 [1] : vector<16x128xf32> to vector<16xf32>
    %165 = vector.shape_cast %164 : vector<16xf32> to vector<16x1xf32>
    %cst_57 = arith.constant 1.280000e+02 : f32
    %166 = vector.broadcast %cst_57 : f32 to vector<16x1xf32>
    %167 = arith.divf %165, %166 : vector<16x1xf32>
    %168 = vector.broadcast %167 : vector<16x1xf32> to vector<16x128xf32>
    %169 = arith.subf %163, %168 : vector<16x128xf32>
    %170 = arith.mulf %169, %169 : vector<16x128xf32>
    %cst_58 = arith.constant dense<0.000000e+00> : vector<16xf32>
    %171 = vector.multi_reduction <add>, %170, %cst_58 [1] : vector<16x128xf32> to vector<16xf32>
    %172 = vector.shape_cast %171 : vector<16xf32> to vector<16x1xf32>
    %cst_59 = arith.constant 1.280000e+02 : f32
    %173 = vector.broadcast %cst_59 : f32 to vector<16x1xf32>
    %174 = arith.divf %172, %173 : vector<16x1xf32>
    %175 = vector.broadcast %167 : vector<16x1xf32> to vector<16x128xf32>
    %176 = arith.subf %163, %175 : vector<16x128xf32>
    %cst_60 = arith.constant 9.99999974E-6 : f32
    %177 = vector.broadcast %cst_60 : f32 to vector<16x1xf32>
    %178 = arith.addf %174, %177 : vector<16x1xf32>
    %179 = math.rsqrt %178 : vector<16x1xf32>
    %180 = vector.broadcast %179 : vector<16x1xf32> to vector<16x128xf32>
    %181 = arith.mulf %176, %180 : vector<16x128xf32>
    %c0_61 = arith.constant 0 : index
    %c0_62 = arith.constant 0 : index
    %c0_63 = arith.constant 0 : index
    %182 = vector.load %arg7[%c0_61, %c0_62, %c0_63] : memref<1x1x128xf32, #tpu.memory_space<vmem>>, vector<1x1x128xf32>
    %183 = vector.shape_cast %182 : vector<1x1x128xf32> to vector<1x128xf32>
    %184 = vector.broadcast %183 : vector<1x128xf32> to vector<16x128xf32>
    %185 = arith.mulf %181, %184 : vector<16x128xf32>
    %c0_64 = arith.constant 0 : index
    %c0_65 = arith.constant 0 : index
    %c0_66 = arith.constant 0 : index
    %186 = vector.load %arg8[%c0_64, %c0_65, %c0_66] : memref<1x1x128xf32, #tpu.memory_space<vmem>>, vector<1x1x128xf32>
    %187 = vector.shape_cast %186 : vector<1x1x128xf32> to vector<1x128xf32>
    %188 = vector.broadcast %187 : vector<1x128xf32> to vector<16x128xf32>
    %189 = arith.addf %185, %188 : vector<16x128xf32>
    %c0_67 = arith.constant 0 : index
    %c0_68 = arith.constant 0 : index
    %c0_69 = arith.constant 0 : index
    %190 = vector.load %arg9[%c0_67, %c0_68, %c0_69] : memref<1x128x256xf32, #tpu.memory_space<vmem>>, vector<1x128x256xf32>
    %191 = vector.shape_cast %190 : vector<1x128x256xf32> to vector<128x256xf32>
    %cst_70 = arith.constant dense<0.000000e+00> : vector<16x256xf32>
    %192 = tpu.matmul %189, %191, %cst_70 {dimension_numbers = #tpu.dot_dimension_numbers<[1], [0], [0], [1], [0, 0, 1, 1], [], []>} : vector<16x128xf32>, vector<128x256xf32>, vector<16x256xf32> -> vector<16x256xf32>
    %c0_71 = arith.constant 0 : index
    %c0_72 = arith.constant 0 : index
    %c0_73 = arith.constant 0 : index
    %193 = vector.load %arg10[%c0_71, %c0_72, %c0_73] : memref<1x1x256xf32, #tpu.memory_space<vmem>>, vector<1x1x256xf32>
    %194 = vector.shape_cast %193 : vector<1x1x256xf32> to vector<1x256xf32>
    %195 = vector.broadcast %194 : vector<1x256xf32> to vector<16x256xf32>
    %196 = arith.addf %192, %195 : vector<16x256xf32>
    %cst_74 = arith.constant 0.000000e+00 : f32
    %197 = vector.broadcast %cst_74 : f32 to vector<16x256xf32>
    %198 = arith.maximumf %196, %197 : vector<16x256xf32>
    %c0_75 = arith.constant 0 : index
    %c0_76 = arith.constant 0 : index
    %c0_77 = arith.constant 0 : index
    %199 = vector.load %arg11[%c0_75, %c0_76, %c0_77] : memref<1x256x128xf32, #tpu.memory_space<vmem>>, vector<1x256x128xf32>
    %200 = vector.shape_cast %199 : vector<1x256x128xf32> to vector<256x128xf32>
    %cst_78 = arith.constant dense<0.000000e+00> : vector<16x128xf32>
    %201 = tpu.matmul %198, %200, %cst_78 {dimension_numbers = #tpu.dot_dimension_numbers<[1], [0], [0], [1], [0, 0, 1, 1], [], []>} : vector<16x256xf32>, vector<256x128xf32>, vector<16x128xf32> -> vector<16x128xf32>
    %c0_79 = arith.constant 0 : index
    %c0_80 = arith.constant 0 : index
    %c0_81 = arith.constant 0 : index
    %202 = vector.load %arg12[%c0_79, %c0_80, %c0_81] : memref<1x1x128xf32, #tpu.memory_space<vmem>>, vector<1x1x128xf32>
    %203 = vector.shape_cast %202 : vector<1x1x128xf32> to vector<1x128xf32>
    %204 = vector.broadcast %203 : vector<1x128xf32> to vector<16x128xf32>
    %205 = arith.addf %201, %204 : vector<16x128xf32>
    %206 = arith.addf %189, %205 : vector<16x128xf32>
    %cst_82 = arith.constant dense<0.000000e+00> : vector<16xf32>
    %207 = vector.multi_reduction <add>, %206, %cst_82 [1] : vector<16x128xf32> to vector<16xf32>
    %208 = vector.shape_cast %207 : vector<16xf32> to vector<16x1xf32>
    %cst_83 = arith.constant 1.280000e+02 : f32
    %209 = vector.broadcast %cst_83 : f32 to vector<16x1xf32>
    %210 = arith.divf %208, %209 : vector<16x1xf32>
    %211 = vector.broadcast %210 : vector<16x1xf32> to vector<16x128xf32>
    %212 = arith.subf %206, %211 : vector<16x128xf32>
    %213 = arith.mulf %212, %212 : vector<16x128xf32>
    %cst_84 = arith.constant dense<0.000000e+00> : vector<16xf32>
    %214 = vector.multi_reduction <add>, %213, %cst_84 [1] : vector<16x128xf32> to vector<16xf32>
    %215 = vector.shape_cast %214 : vector<16xf32> to vector<16x1xf32>
    %cst_85 = arith.constant 1.280000e+02 : f32
    %216 = vector.broadcast %cst_85 : f32 to vector<16x1xf32>
    %217 = arith.divf %215, %216 : vector<16x1xf32>
    %218 = vector.broadcast %210 : vector<16x1xf32> to vector<16x128xf32>
    %219 = arith.subf %206, %218 : vector<16x128xf32>
    %cst_86 = arith.constant 9.99999974E-6 : f32
    %220 = vector.broadcast %cst_86 : f32 to vector<16x1xf32>
    %221 = arith.addf %217, %220 : vector<16x1xf32>
    %222 = math.rsqrt %221 : vector<16x1xf32>
    %223 = vector.broadcast %222 : vector<16x1xf32> to vector<16x128xf32>
    %224 = arith.mulf %219, %223 : vector<16x128xf32>
    %c0_87 = arith.constant 0 : index
    %c0_88 = arith.constant 0 : index
    %c0_89 = arith.constant 0 : index
    %225 = vector.load %arg13[%c0_87, %c0_88, %c0_89] : memref<1x1x128xf32, #tpu.memory_space<vmem>>, vector<1x1x128xf32>
    %226 = vector.shape_cast %225 : vector<1x1x128xf32> to vector<1x128xf32>
    %227 = vector.broadcast %226 : vector<1x128xf32> to vector<16x128xf32>
    %228 = arith.mulf %224, %227 : vector<16x128xf32>
    %c0_90 = arith.constant 0 : index
    %c0_91 = arith.constant 0 : index
    %c0_92 = arith.constant 0 : index
    %229 = vector.load %arg14[%c0_90, %c0_91, %c0_92] : memref<1x1x128xf32, #tpu.memory_space<vmem>>, vector<1x1x128xf32>
    %230 = vector.shape_cast %229 : vector<1x1x128xf32> to vector<1x128xf32>
    %231 = vector.broadcast %230 : vector<1x128xf32> to vector<16x128xf32>
    %232 = arith.addf %228, %231 : vector<16x128xf32>
    %233 = vector.shape_cast %232 : vector<16x128xf32> to vector<2x8x128xf32>
    %c0_93 = arith.constant 0 : index
    %c0_94 = arith.constant 0 : index
    %c0_95 = arith.constant 0 : index
    %234 = vector.load %arg16[%c0_93, %c0_94, %c0_95] : memref<2x8x128xf32, #tpu.memory_space<vmem>>, vector<2x8x128xf32>
    tpu.vector_store %arg16[%c0_93, %c0_94, %c0_95], %233 {strides = array<i32>} : memref<2x8x128xf32, #tpu.memory_space<vmem>>, vector<2x8x128xf32>,
    %c3_i32 = arith.constant 3 : i32
    %235 = arith.cmpi eq, %arg1, %c3_i32 : i32
    %236 = arith.extui %235 : i1 to i32
    %c0_i32_96 = arith.constant 0 : i32
    %237 = arith.cmpi ne, %236, %c0_i32_96 : i32
    scf.if %237 {
      %cst_97 = arith.constant dense<0.000000e+00> : vector<2x128xf32>
      %238 = vector.multi_reduction <add>, %233, %cst_97 [1] : vector<2x8x128xf32> to vector<2x128xf32>
      %cst_98 = arith.constant 8.000000e+00 : f32
      %239 = vector.broadcast %cst_98 : f32 to vector<2x128xf32>
      %240 = arith.divf %238, %239 : vector<2x128xf32>
      %c0_99 = arith.constant 0 : index
      %c0_100 = arith.constant 0 : index
      %241 = vector.load %arg15[%c0_99, %c0_100] : memref<2x128xf32, #tpu.memory_space<vmem>>, vector<2x128xf32>
      tpu.vector_store %arg15[%c0_99, %c0_100], %240 {strides = array<i32>} : memref<2x128xf32, #tpu.memory_space<vmem>>, vector<2x128xf32>,
    } else {
    }
    return
  }
  func.func @transform_0(%arg0: i32, %arg1: i32) -> (i32, i32, i32) {
    %c0_i32 = arith.constant 0 : i32
    %c0_i32_0 = arith.constant 0 : i32
    %c0_i32_1 = arith.constant 0 : i32
    return %arg0, %c0_i32, %c0_i32_0 : i32, i32, i32
  }
  func.func @transform_1(%arg0: i32, %arg1: i32) -> (i32, i32, i32) {
    %c0_i32 = arith.constant 0 : i32
    %c0_i32_0 = arith.constant 0 : i32
    %c0_i32_1 = arith.constant 0 : i32
    return %arg1, %c0_i32, %c0_i32_0 : i32, i32, i32
  }
  func.func @transform_2(%arg0: i32, %arg1: i32) -> (i32, i32, i32) {
    %c0_i32 = arith.constant 0 : i32
    %c0_i32_0 = arith.constant 0 : i32
    %c0_i32_1 = arith.constant 0 : i32
    return %arg1, %c0_i32, %c0_i32_0 : i32, i32, i32
  }
  func.func @transform_3(%arg0: i32, %arg1: i32) -> (i32, i32, i32) {
    %c0_i32 = arith.constant 0 : i32
    %c0_i32_0 = arith.constant 0 : i32
    %c0_i32_1 = arith.constant 0 : i32
    return %arg1, %c0_i32, %c0_i32_0 : i32, i32, i32
  }
  func.func @transform_4(%arg0: i32, %arg1: i32) -> (i32, i32, i32) {
    %c0_i32 = arith.constant 0 : i32
    %c0_i32_0 = arith.constant 0 : i32
    %c0_i32_1 = arith.constant 0 : i32
    return %arg1, %c0_i32, %c0_i32_0 : i32, i32, i32
  }
  func.func @transform_5(%arg0: i32, %arg1: i32) -> (i32, i32, i32) {
    %c0_i32 = arith.constant 0 : i32
    %c0_i32_0 = arith.constant 0 : i32
    %c0_i32_1 = arith.constant 0 : i32
    return %arg1, %c0_i32, %c0_i32_0 : i32, i32, i32
  }
  func.func @transform_6(%arg0: i32, %arg1: i32) -> (i32, i32, i32) {
    %c0_i32 = arith.constant 0 : i32
    %c0_i32_0 = arith.constant 0 : i32
    %c0_i32_1 = arith.constant 0 : i32
    return %arg1, %c0_i32, %c0_i32_0 : i32, i32, i32
  }
  func.func @transform_7(%arg0: i32, %arg1: i32) -> (i32, i32, i32) {
    %c0_i32 = arith.constant 0 : i32
    %c0_i32_0 = arith.constant 0 : i32
    %c0_i32_1 = arith.constant 0 : i32
    return %arg1, %c0_i32, %c0_i32_0 : i32, i32, i32
  }
  func.func @transform_8(%arg0: i32, %arg1: i32) -> (i32, i32, i32) {
    %c0_i32 = arith.constant 0 : i32
    %c0_i32_0 = arith.constant 0 : i32
    %c0_i32_1 = arith.constant 0 : i32
    return %arg1, %c0_i32, %c0_i32_0 : i32, i32, i32
  }
  func.func @transform_9(%arg0: i32, %arg1: i32) -> (i32, i32, i32) {
    %c0_i32 = arith.constant 0 : i32
    %c0_i32_0 = arith.constant 0 : i32
    %c0_i32_1 = arith.constant 0 : i32
    return %arg1, %c0_i32, %c0_i32_0 : i32, i32, i32
  }
  func.func @transform_10(%arg0: i32, %arg1: i32) -> (i32, i32, i32) {
    %c0_i32 = arith.constant 0 : i32
    %c0_i32_0 = arith.constant 0 : i32
    %c0_i32_1 = arith.constant 0 : i32
    return %arg1, %c0_i32, %c0_i32_0 : i32, i32, i32
  }
  func.func @transform_11(%arg0: i32, %arg1: i32) -> (i32, i32, i32) {
    %c0_i32 = arith.constant 0 : i32
    %c0_i32_0 = arith.constant 0 : i32
    %c0_i32_1 = arith.constant 0 : i32
    return %arg1, %c0_i32, %c0_i32_0 : i32, i32, i32
  }
  func.func @transform_12(%arg0: i32, %arg1: i32) -> (i32, i32, i32) {
    %c0_i32 = arith.constant 0 : i32
    %c0_i32_0 = arith.constant 0 : i32
    %c0_i32_1 = arith.constant 0 : i32
    return %arg1, %c0_i32, %c0_i32_0 : i32, i32, i32
  }
  func.func @transform_13(%arg0: i32, %arg1: i32) -> (i32, i32) {
    %c0_i32 = arith.constant 0 : i32
    %c0_i32_0 = arith.constant 0 : i32
    return %arg0, %c0_i32 : i32, i32
  }
}

</mosaic_0001>

<bundles_post_ra>
// kernel: tpu_custom_call.1
= control target key start
LH: loop header
LB: loop body
LE: loop exit
PB: predicated region body
PF: predicated region fallthrough
CT: control target
= control target key end

     0   :  { %s6419_s0 = inlined_call_operand.hbm [shape: f32[2,8,128], index: 0, kind: input, shape index: {}]   ;;  %s6420_s1 = inlined_call_operand.hbm [shape: f32[4,128,384], index: 1, kind: input, shape index: {}]   ;;  %s6421_s2 = inlined_call_operand.hbm [shape: f32[4,1,384], index: 2, kind: input, shape index: {}]   ;;  %s6422_s3 = inlined_call_operand.hbm [shape: f32[4,128,128], index: 3, kind: input, shape index: {}]   ;;  %s6423_s4 = inlined_call_operand.vmem [shape: f32[4,1,128], index: 4, kind: input, shape index: {}]   ;;  %s6424_s5 = inlined_call_operand.hbm [shape: f32[4,1,128], index: 5, kind: input, shape index: {}]   ;;  %s6425_s6 = inlined_call_operand.hbm [shape: f32[4,1,128], index: 6, kind: input, shape index: {}]   ;;  %s6426_s7 = inlined_call_operand.hbm [shape: f32[4,128,256], index: 7, kind: input, shape index: {}]   ;;  %s6427_s8 = inlined_call_operand.vmem [shape: f32[4,1,256], index: 8, kind: input, shape index: {}]   ;;  %s6428_s9 = inlined_call_operand.hbm [shape: f32[4,256,128], index: 9, kind: input, shape index: {}]   ;;  %s6429_s10 = inlined_call_operand.vmem [shape: f32[4,1,128], index: 10, kind: input, shape index: {}]   ;;  %s6430_s11 = inlined_call_operand.vmem [shape: f32[4,1,128], index: 11, kind: input, shape index: {}]   ;;  %s6431_s12 = inlined_call_operand.hbm [shape: f32[4,1,128], index: 12, kind: input, shape index: {}]   ;;  %s6432_s13 = inlined_call_operand.hbm [shape: f32[2,128], index: 13, kind: output, shape index: {}]  }
   0x1   :  { %6445 = sst [smem:[#allocation29_spill]] %s6419_s0 }
   0x2   :  { %6446 = sst [smem:[#allocation30_spill]] %s6420_s1 }
   0x3   :  { %6447 = sst [smem:[#allocation31_spill]] %s6421_s2 }
   0x4   :  { %6448 = sst [smem:[#allocation32_spill]] %s6422_s3 }
   0x5   :  { %6449 = sst [smem:[#allocation33_spill]] %s6423_s4 }
   0x6   :  { %6450 = sst [smem:[#allocation34_spill]] %s6424_s5 }
   0x7   :  { %6451 = sst [smem:[#allocation35_spill]] %s6425_s6 }
   0x8   :  { %6452 = sst [smem:[#allocation36_spill]] %s6426_s7 }
   0x9   :  { %6453 = sst [smem:[#allocation37_spill]] %s6427_s8 }
   0xa   :  { %6454 = sst [smem:[#allocation38_spill]] %s6429_s10 }
   0xb   :  { %6455 = sst [smem:[#allocation39_spill]] %s6430_s11 }
   0xc   :  { %6456 = sst [smem:[#allocation40_spill]] %s6431_s12 }
   0xd   :  { %6457 = sst [smem:[#allocation41_spill]] %s6432_s13 }
   0xe   :  { %18 = vsyncpa [#allocation4], 0 }
   0xf   :  { %19 = vsyncpa [#allocation7], 0 }
  0x10   :  { %21 = vsyncpa [#allocation7 + $0x1], 0 }
  0x11   :  { %22 = vsyncpa [#allocation10], 0 }
  0x12   :  { %24 = vsyncpa [#allocation10 + $0x1], 0 }
  0x13   :  { %25 = vsyncpa [#allocation13], 0 }
  0x14   :  { %27 = vsyncpa [#allocation13 + $0x1], 0 }
  0x15   :  { %28 = vsyncpa [#allocation16], 0 }
  0x16   :  { %30 = vsyncpa [#allocation16 + $0x1], 0 }
  0x17   :  { %31 = vsyncpa [#allocation5], 0  ;;  %s5594_s25 = smov 0   ;;  %s5596_s26 = smov 0  }
  0x18   :  { %s5598_s27 = smov 0   ;;  %s5600_s28 = smov 0  }
  0x19   :  { %s5602_s29 = smov 0   ;;  %s5604_s30 = smov 0  }
  0x1a LB: > { %6458 = sst [smem:[#allocation25_spill]] %s5485_s27  ;;  %s46_s14 = sadd.s32 1, %s5493_s29  ;;  %s5497_s30 = sphi %s5604_s30, %s37_s30   ;;  %s5493_s29 = sphi %s5602_s29, %s6501_s29   ;;  %s5489_s28 = sphi %s5600_s28, %s6500_s28   ;;  %s5485_s27 = sphi %s5598_s27, %s6496_s27   ;;  %s5481_s26 = sphi %s5596_s26, %s6499_s26   ;;  %s5477_s25 = sphi %s5594_s25, %s6498_s25  }
  0x1b   : > { %6459 = sst [smem:[#allocation26_spill]] %s5489_s28  ;;  %s82_s15 = sadd.s32 1, %s5485_s27 }
  0x1c   : > { %p47_p0 = scmp.ge.s32.totalorder %s46_s14, 4  ;;  %p89_p1 = scmp.ne.s32.totalorder %s5485_s27, %s5481_s26 }
  0x1d   : > { %p90_p2 = scmp.eq.s32.totalorder %s5497_s30, 0  ;;  %p4975_p4 = scmp.lt.s32.totalorder %s5497_s30, 4 }
  0x1e   : > { %s6503_s14 = smov (%p47_p0, %s46_s14), 0  ;;  %s5635_s17 = sand.u32 1, %s5497_s30  }
  0x1f   : > { %6460 = sst [smem:[#allocation27_spill]] %s6503_s14  ;;  %p91_p3 = por %p90_p2, %p89_p1 }
  0x20   : > { %s79_s16 = ssub.s32 %s5493_s29, %s6503_s14  ;;  %s5638_s18 = sand.u32 1, %s5485_s27  }
  0x21   : > { %p80_p5 = scmp.eq.s32.totalorder %s79_s16, 0  ;;  %s4916_s19 = smul.u32 6144, %s5493_s29 }
  0x22   : > { %s4915_s21 = smul.u32 384, %s5638_s18  ;;  %s6462_s1 = sld [smem:[#allocation30_spill]] }
  0x23   : > { %s5642_s20 = scalar_select %p80_p5, %s5485_s27, %s82_s15  }
  0x24   : > { %p5648_p6 = pnand %p4975_p4, %p91_p3  ;;  %s451_s14 = scalar_lea.vmem [#allocation6], %s4915_s21 }
  0x25   : > { %6461 = sst [smem:[#allocation28_spill]] %s5642_s20  ;;  %s458_s11 = sshll.u32 %s451_s14, 4  ;;  %s459_s11 = int_to_ptr.vmem [resolvable:$true] %s458_s11 }
  0x26   : > { %s6436_s16 = scalar_lea.sflag [#allocation7], %s5635_s17  ;;  %p5655_p7 = pneg %p5648_p6 }
  0x27   : > { %s5166_s15 = scalar_lea.vmem %s459_s11, 6144 }
  0x28   : > { %s457_s24 = scalar_lea.hbm %s6462_s1, %s4916_s19  ;;  %p5167_p8 = scmp.ne.s32.totalorder %s459_s11, %s5166_s15 }
  0x29   : > { %s5499_s19 = smov [#allocation6]  }
  0x2a   : > { %p5169_p9 = pnand %p5167_p8, %p5655_p7  ;;  %s5171_s22 = sshll.u32 %s5499_s19, 4  ;;  %s5172_s22 = int_to_ptr.vmem [resolvable:$false] %s5171_s22 }
  0x2b   : > { %s5173_s23 = scalar_lea.vmem %s5172_s22, 12288  ;;  %p5174_p11 = scmp.lt.s32.totalorder %s459_s11, %s5172_s22 }
  0x2c   : > { %p5170_p10 = pneg %p5169_p9  ;;  %p5175_p12 = scmp.lt.s32.totalorder %s5173_s23, %s5166_s15 }
  0x2e   : > { %p5176_p13 = por %p5175_p12, %p5174_p11 }
  0x30   : > { %p5177_p0 = pnand %p5176_p13, %p5170_p10 }
  0x32   : > { %5180 = shalt.err (!%p5177_p0)
}
  0x33   : > { %s5500_s14 = smov 384   ;;  %s5501_s21 = smov 24  }
  0x34   : > { %4952 = dma.hbm_to_vmem [thread:$0]  (!%p5648_p6), %s457_s24, 6144, %s459_s11, %s6436_s16, %s5500_s14, %s5500_s14, %s5501_s21  }
  0x35   : > { %s4466_s19 = sshll.u32 %s5638_s18, 7  ;;  %s4544_s1 = sshll.u32 %s5493_s29, 11 }
  0x36   : > { %s6465_s3 = sld [smem:[#allocation32_spill]]  ;;  %s491_s23 = scalar_lea.vmem [#allocation9], %s4466_s19 }
  0x37   : > { %s498_s27 = sshll.u32 %s491_s23, 4  ;;  %s5671_s8 = sshll.u32 %s5493_s29, 4  ;;  %s499_s27 = int_to_ptr.vmem [resolvable:$true] %s498_s27 }
  0x38   : > { %s6437_s4 = scalar_lea.sflag [#allocation10], %s5635_s17  ;;  %s5194_s28 = scalar_lea.vmem %s499_s27, 2048 }
  0x39   : > { %p5195_p1 = scmp.ne.s32.totalorder %s499_s27, %s5194_s28  ;;  %s5502_s12 = smov [#allocation9]  }
  0x3a   : > { %s5199_s5 = sshll.u32 %s5502_s12, 4  ;;  %s5200_s5 = int_to_ptr.vmem [resolvable:$false] %s5199_s5 }
  0x3b   : > { %p5197_p2 = pnand %p5195_p1, %p5655_p7  ;;  %s5201_s11 = scalar_lea.vmem %s5200_s5, 4096 }
  0x3c   : > { %s497_s15 = scalar_lea.hbm %s6465_s3, %s4544_s1  ;;  %p5202_p4 = scmp.lt.s32.totalorder %s499_s27, %s5200_s5 }
  0x3d   : > { %p5198_p3 = pneg %p5197_p2  ;;  %p5203_p5 = scmp.lt.s32.totalorder %s5201_s11, %s5194_s28 }
  0x3f   : > { %p5204_p8 = por %p5203_p5, %p5202_p4 }
  0x41   : > { %p5205_p9 = pnand %p5204_p8, %p5198_p3 }
  0x43   : > { %5208 = shalt.err (!%p5205_p9)
}
  0x44   : > { %s6438_s1 = smov 128   ;;  %s6440_s20 = smov 8  }
  0x45   : > { %4958 = dma.hbm_to_vmem [thread:$0]  (!%p5648_p6), %s497_s15, 2048, %s499_s27, %s6437_s4, %s6438_s1, %s6438_s1, %s6440_s20  }
  0x46   : > { %s6466_s6 = sld [smem:[#allocation35_spill]]  ;;  %s534_s24 = scalar_lea.vmem [#allocation12], %s5638_s18 }
  0x47   : > { %s541_s14 = sshll.u32 %s534_s24, 4  ;;  %s4471_s21 = sshll.u32 %s5638_s18, 8  ;;  %s542_s14 = int_to_ptr.vmem [resolvable:$true] %s541_s14 }
  0x48   : > { %s6444_s19 = scalar_lea.sflag [#allocation13], %s5635_s17  ;;  %s5222_s22 = scalar_lea.vmem %s542_s14, 16 }
  0x49   : > { %p5223_p10 = scmp.ne.s32.totalorder %s542_s14, %s5222_s22  ;;  %s5505_s23 = smov [#allocation12]  }
  0x4a   : > { %s5227_s11 = sshll.u32 %s5505_s23, 4  ;;  %s5228_s11 = int_to_ptr.vmem [resolvable:$false] %s5227_s11 }
  0x4b   : > { %p5225_p11 = pnand %p5223_p10, %p5655_p7  ;;  %s5229_s16 = scalar_lea.vmem %s5228_s11, 32 }
  0x4c   : > { %s539_s28 = scalar_lea.hbm %s6466_s6, %s5671_s8  ;;  %p5230_p13 = scmp.lt.s32.totalorder %s542_s14, %s5228_s11 }
  0x4d   : > { %p5226_p12 = pneg %p5225_p11  ;;  %p5231_p0 = scmp.lt.s32.totalorder %s5229_s16, %s5222_s22 }
  0x4f   : > { %p5232_p1 = por %p5231_p0, %p5230_p13 }
  0x51   : > { %p5233_p2 = pnand %p5232_p1, %p5226_p12 }
  0x53   : > { %5236 = shalt.err (!%p5233_p2)
}
  0x54   : > { %4964 = dma.hbm_to_vmem [thread:$0]  (!%p5648_p6), %s539_s28, 16, %s542_s14, %s6444_s19  }
  0x55   : > { %s4545_s27 = sshll.u32 %s5493_s29, 12  ;;  %s552_s15 = scalar_lea.vmem [#allocation14], %s4471_s21 }
  0x56   : > { %s559_s5 = sshll.u32 %s552_s15, 4  ;;  %s6467_s7 = sld [smem:[#allocation36_spill]]  ;;  %s5702_s5 = int_to_ptr.vmem [resolvable:$true] %s559_s5 }
  0x57   : > { %s586_s11 = scalar_lea.hbm %s6428_s9, %s4545_s27  ;;  %s580_s4 = scalar_lea.vmem [#allocation15], %s4471_s21 }
  0x58   : > { %s587_s1 = sshll.u32 %s580_s4, 4  ;;  %s6442_s20 = scalar_lea.sflag [#allocation16], %s5635_s17  ;;  %s588_s1 = int_to_ptr.vmem [resolvable:$true] %s587_s1 }
  0x59   : > { %s5250_s3 = scalar_lea.vmem %s588_s1, 4096  ;;  %s5506_s28 = smov [#allocation15]  }
  0x5a   : > { %p5251_p3 = scmp.ne.s32.totalorder %s588_s1, %s5250_s3  ;;  %s5255_s14 = sshll.u32 %s5506_s28, 4  ;;  %s5256_s14 = int_to_ptr.vmem [resolvable:$false] %s5255_s14 }
  0x5b   : > { %s5257_s15 = scalar_lea.vmem %s5256_s14, 8192  ;;  %p5258_p8 = scmp.lt.s32.totalorder %s588_s1, %s5256_s14 }
  0x5c   : > { %s5700_s23 = scalar_lea.hbm %s6467_s7, %s4545_s27  ;;  %p5253_p4 = pnand %p5251_p3, %p5655_p7 }
  0x5d   : > { %p5259_p9 = scmp.lt.s32.totalorder %s5257_s15, %s5250_s3 }
  0x5e   : > { %p5254_p5 = pneg %p5253_p4 }
  0x5f   : > { %p5260_p10 = por %p5259_p9, %p5258_p8 }
  0x61   : > { %p5261_p11 = pnand %p5260_p10, %p5254_p5 }
  0x63   : > { %5264 = shalt.err (!%p5261_p11)
}
  0x64   : > { %s6468_s21 = smov 8   ;;  %s6469_s4 = smov 128  }
  0x65   : > { %4970 = dma.hbm_to_vmem [thread:$0]  (!%p5648_p6), %s586_s11, 4096, %s588_s1, %s6442_s20, %s6469_s4, %s6469_s4, %s6468_s21  }
  0x66   : > { %s5718_s27 = sadd.s32 4294967295, %s5497_s30   ;;  %p95_p12 = scmp.ne.s32.totalorder %s5481_s26, %s5477_s25 }
  0x67   : > { %p6443_p13 = scmp.eq.s32.totalorder %s5718_s27, 0  ;;  %p4461_p0 = scmp.ge.s32.totalorder %s5497_s30, 1 }
  0x68   : > { %p418_p1 = scmp.lt.s32.totalorder %s5497_s30, 5  ;;  %s5507_s1 = smov [#allocation3]  }
  0x69   : > { %p5727_p2 = por %p6443_p13, %p95_p12  ;;  %s433_s24 = sshll.u32 %s5507_s1, 4  ;;  %s434_s24 = int_to_ptr.vmem [resolvable:$true] %s433_s24 }
  0x6a   : > { %p5731_p3 = pnand %p4461_p0, %p418_p1  ;;  %s4917_s16 = smul.u32 3, %s5638_s18 }
  0x6b   : > { %s4918_s25 = smul.u32 48, %s5493_s29  ;;  %s6473_s2 = sld [smem:[#allocation31_spill]] }
  0x6c   : > { %p4945_p4 = pneg %p5731_p3  ;;  %s472_s11 = scalar_lea.vmem [#allocation8], %s4917_s16 }
  0x6d   : > { %s480_s28 = sshll.u32 %s472_s11, 4  ;;  %s5276_s1 = scalar_lea.vmem %s434_s24, 256  ;;  %s481_s28 = int_to_ptr.vmem [resolvable:$true] %s480_s28 }
  0x6e   : > { %p5741_p5 = pnand %p4945_p4, %p6443_p13  ;;  %p5277_p9 = scmp.ne.s32.totalorder %s434_s24, %s5276_s1 }
  0x6f   : > { %p5284_p12 = scmp.lt.s32.totalorder %s434_s24, %s434_s24  ;;  %p5285_p0 = scmp.lt.s32.totalorder %s5276_s1, %s5276_s1 }
  0x70   : > { %p5267_p8 = pneg %p5741_p5 }
  0x71   : > { %s478_s20 = scalar_lea.hbm %s6473_s2, %s4918_s25  ;;  %p5286_p1 = por %p5285_p0, %p5284_p12 }
  0x72   : > { %p5279_p10 = pnand %p5277_p9, %p5267_p8 }
  0x74   : > { %p5280_p11 = pneg %p5279_p10 }
  0x76   : > { %p5287_p4 = pnand %p5286_p1, %p5280_p11 }
  0x78   : > { %5290 = shalt.err (!%p5287_p4)
}
  0x79   : > { %s6474_s0 = sld [smem:[#allocation29_spill]]  ;;  %s5304_s25 = scalar_lea.vmem %s481_s28, 48 }
  0x7a   : > { %p5305_p13 = scmp.ne.s32.totalorder %s481_s28, %s5304_s25  ;;  %s5508_s14 = smov [#allocation8]  }
  0x7b   : > { %s5309_s15 = sshll.u32 %s5508_s14, 4  ;;  %s5310_s15 = int_to_ptr.vmem [resolvable:$false] %s5309_s15 }
  0x7c   : > { %p5307_p8 = pnand %p5305_p13, %p5655_p7  ;;  %s5311_s1 = scalar_lea.vmem %s5310_s15, 96 }
  0x7d   : > { %p5312_p10 = scmp.lt.s32.totalorder %s481_s28, %s5310_s15  ;;  %p5313_p11 = scmp.lt.s32.totalorder %s5311_s1, %s5304_s25 }
  0x7e   : > { %p5308_p9 = pneg %p5307_p8 }
  0x7f   : > { %4948 = dma.hbm_to_vmem [thread:$0]  (!%p5741_p5), %s6474_s0, 256, %s434_s24, [#allocation4], %s6469_s4, %s6469_s4, %s6468_s21  }
  0x80   : > { %p5314_p12 = por %p5313_p11, %p5312_p10 }
  0x82   : > { %p5315_p0 = pnand %p5314_p12, %p5308_p9 }
  0x84   : > { %5318 = shalt.err (!%p5315_p0)
}
  0x85   : > { %s6475_s22 = scalar_lea.sflag [#allocation7], %s5635_s17  ;;  %s6476_s24 = sld [smem:[#allocation34_spill]] }
  0x86   : > { %4955 = dma.hbm_to_vmem [thread:$0]  (!%p5648_p6), %s478_s20, 48, %s481_s28, %s6475_s22  }
  0x87   : > { %s517_s11 = scalar_lea.vmem [#allocation11], %s5638_s18  ;;  %s5509_s25 = smov [#allocation11]  }
  0x88   : > { %s524_s14 = sshll.u32 %s517_s11, 4  ;;  %s5337_s1 = sshll.u32 %s5509_s25, 4  ;;  %s525_s14 = int_to_ptr.vmem [resolvable:$true] %s524_s14  ;;  %s5338_s1 = int_to_ptr.vmem [resolvable:$false] %s5337_s1 }
  0x89   : > { %s5332_s15 = scalar_lea.vmem %s525_s14, 16  ;;  %s5339_s19 = scalar_lea.vmem %s5338_s1, 32 }
  0x8a   : > { %p5333_p13 = scmp.ne.s32.totalorder %s525_s14, %s5332_s15  ;;  %p5340_p4 = scmp.lt.s32.totalorder %s525_s14, %s5338_s1 }
  0x8b   : > { %s522_s16 = scalar_lea.hbm %s6476_s24, %s5671_s8  ;;  %p5341_p8 = scmp.lt.s32.totalorder %s5339_s19, %s5332_s15 }
  0x8c   : > { %p5335_p5 = pnand %p5333_p13, %p5655_p7 }
  0x8d   : > { %p5342_p9 = por %p5341_p8, %p5340_p4 }
  0x8e   : > { %p5336_p1 = pneg %p5335_p5 }
  0x90   : > { %p5343_p10 = pnand %p5342_p9, %p5336_p1 }
  0x92   : > { %5346 = shalt.err (!%p5343_p10)
}
  0x93   : > { %s6477_s20 = scalar_lea.sflag [#allocation10], %s5635_s17  ;;  %s5360_s28 = scalar_lea.vmem %s5702_s5, 4096 }
  0x94   : > { %4961 = dma.hbm_to_vmem [thread:$0]  (!%p5648_p6), %s522_s16, 16, %s525_s14, %s6477_s20  }
  0x95   : > { %p5361_p11 = scmp.ne.s32.totalorder %s5702_s5, %s5360_s28  ;;  %s5510_s22 = smov [#allocation14]  }
  0x96   : > { %s5365_s21 = sshll.u32 %s5510_s22, 4  ;;  %s5366_s21 = int_to_ptr.vmem [resolvable:$false] %s5365_s21 }
  0x97   : > { %p5363_p12 = pnand %p5361_p11, %p5655_p7  ;;  %s5367_s19 = scalar_lea.vmem %s5366_s21, 8192 }
  0x98   : > { %p5368_p13 = scmp.lt.s32.totalorder %s5702_s5, %s5366_s21  ;;  %p5369_p5 = scmp.lt.s32.totalorder %s5367_s19, %s5360_s28 }
  0x99   : > { %p5364_p0 = pneg %p5363_p12 }
  0x9a   : > { %p5370_p1 = por %p5369_p5, %p5368_p13 }
  0x9c   : > { %p5371_p4 = pnand %p5370_p1, %p5364_p0 }
  0x9e   : > { %5374 = shalt.err (!%p5371_p4)
}
  0x9f   : > { %s5511_s4 = smov 256   ;;  %s5512_s24 = smov 16  }
  0xa0   : > { %s6478_s16 = scalar_lea.sflag [#allocation13], %s5635_s17  ;;  %s6479_s15 = sld [smem:[#allocation40_spill]] }
  0xa1   : > { %4967 = dma.hbm_to_vmem [thread:$0]  (!%p5648_p6), %s5700_s23, 4096, %s5702_s5, %s6478_s16, %s5511_s4, %s5511_s4, %s5512_s24  }
  0xa2   : > { %s612_s1 = scalar_lea.vmem [#allocation17], %s5638_s18  ;;  %s5513_s22 = smov [#allocation17]  }
  0xa3   : > { %s619_s20 = sshll.u32 %s612_s1, 4  ;;  %s5393_s21 = sshll.u32 %s5513_s22, 4  ;;  %s620_s20 = int_to_ptr.vmem [resolvable:$true] %s619_s20  ;;  %s5394_s21 = int_to_ptr.vmem [resolvable:$false] %s5393_s21 }
  0xa4   : > { %s5388_s28 = scalar_lea.vmem %s620_s20, 16  ;;  %s5395_s19 = scalar_lea.vmem %s5394_s21, 32 }
  0xa5   : > { %p5389_p8 = scmp.ne.s32.totalorder %s620_s20, %s5388_s28  ;;  %p5396_p11 = scmp.lt.s32.totalorder %s620_s20, %s5394_s21 }
  0xa6   : > { %s617_s25 = scalar_lea.hbm %s6479_s15, %s5671_s8  ;;  %p5397_p12 = scmp.lt.s32.totalorder %s5395_s19, %s5388_s28 }
  0xa7   : > { %p5391_p9 = pnand %p5389_p8, %p5655_p7 }
  0xa8   : > { %p5398_p0 = por %p5397_p12, %p5396_p11 }
  0xa9   : > { %p5392_p10 = pneg %p5391_p9 }
  0xab   : > { %p5399_p13 = pnand %p5398_p0, %p5392_p10 }
  0xad   : > { %5402 = shalt.err (!%p5399_p13)
}
  0xae   : > { %s6480_s8 = scalar_lea.sflag [#allocation16], %s5635_s17  ;;  %628 = sbr.rel (%p5731_p3) target bundleno = 6103 (0x17d7), region = 72 }
  0xaf   : > { %4973 = dma.hbm_to_vmem [thread:$0]  (!%p5648_p6), %s617_s25, 16, %s620_s20, %s6480_s8  }
  0xb0   : > { %p6481_p7 = scmp.eq.s32.totalorder (!%p5731_p3), %s5718_s27, 0 }
  0xb3   : > { %5452 = dma.done.wait (%p6481_p7), [#allocation4], 256   ;;  %p6482_p5 = pmov %p6481_p7 }
  0xb4   : > { %s634_s10 = sand.u32 1, %s5718_s27   ;;  %s5805_s18 = sand.u32 1, %s5481_s26  }
  0xb5   : > { %5454 = vsyncadd (%p6482_p5), [#allocation4], 4294967040  ;;  %s4919_s13 = smul.u32 384, %s5805_s18  ;;  %s635_s5 = scalar_lea.sflag [#allocation7], %s634_s10 }
  0xb7   : > { %s5808_s17 = scalar_lea.vmem [#allocation6], %s4919_s13 }
  0xb8   : > { %5456 = dma.done.wait (%p5727_p2), %s635_s5, 6192  }
  0xb9   : > { %5458 = vsyncadd (%p5727_p2), %s635_s5, 4294961104  ;;  %s4920_s23 = smul.u32 3, %s5805_s18  ;;  %s4480_s12 = sshll.u32 %s5805_s18, 7 }
  0xba   : > { %s653_s24 = scalar_lea.sflag [#allocation10], %s634_s10  ;;  %s5818_s16 = scalar_lea.vmem [#allocation9], %s4480_s12 }
  0xbb   : > { %s5816_s4 = scalar_lea.vmem [#allocation8], %s4920_s23 }
  0xbc   : > { %5460 = dma.done.wait (%p5727_p2), %s653_s24, 2064  }
  0xbd   : > { %5462 = vsyncadd (%p5727_p2), %s653_s24, 4294965232  ;;  %s670_s14 = scalar_lea.sflag [#allocation13], %s634_s10 }
  0xbe   : > { %5464 = dma.done.wait (%p5727_p2), %s670_s14, 4112  }
  0xbf   : > { %5466 = vsyncadd (%p5727_p2), %s670_s14, 4294963184  ;;  %s4481_s25 = sshll.u32 %s5805_s18, 8  ;;  %s687_s20 = scalar_lea.sflag [#allocation16], %s634_s10 }
  0xc0   : > { %s5831_s1 = scalar_lea.vmem [#allocation14], %s4481_s25  ;;  %s5833_s28 = scalar_lea.vmem [#allocation15], %s4481_s25 }
  0xc1   : > { %5468 = dma.done.wait (%p5727_p2), %s687_s20, 4112  }
  0xc2   : > { %5470 = vsyncadd (%p5727_p2), %s687_s20, 4294963184  ;;  %s6483_s22 = sld [smem:[#allocation26_spill]]  ;;  %s698_s7 = scalar_lea.vmem [#allocation17], %s5805_s18 }
  0xc3   : > { %s6484_s13 = sld [smem:[#allocation33_spill]] }
  0xc4   : > { %s6485_s24 = sld [smem:[#allocation37_spill]] }
  0xc5   : > { %s6486_s20 = sld [smem:[#allocation38_spill]] }
  0xc6   : > { %s6487_s2 = sld [smem:[#allocation39_spill]] }
  0xc8   : > { %p782_p6 = scmp.lt.s32.totalorder %s6483_s22, 3  ;;  %p4484_p2 = scmp.ne.s32.totalorder %s6483_s22, 0 }
  0xca   : > { %s5841_s21 = scalar_select %p782_p6, %s6483_s22, 3 }
  0xcb   : > { %798 = sbr.rel (%p4484_p2) target bundleno = 210 (0xd2), region = 112 }
  0xcc   : > { %s784_s10 = scalar_lea.vmem %s6484_s13, %s5841_s21  ;;  %s4483_s5 = sshll.u32 %s5841_s21, 1 }
  0xcd   : > { %s5851_s3 = scalar_lea.vmem %s6485_s24, %s4483_s5  ;;  %s791_s15 = scalar_lea.vmem %s6486_s20, %s5841_s21 }
  0xce   : > { %s794_s6 = scalar_lea.vmem %s6487_s2, %s5841_s21 }
  0xd0   : > { %v799_v0 = vld [vmem:[#allocation3] sm:$0xff]  ;;  %v800_v1 = vld [vmem:[#allocation3 + $0x8] sm:$0xff] }
  0xd1   : > { %801 = vst [vmem:[#allocation2] sm:$0xff] %v799_v0  ;;  %802 = vst [vmem:[#allocation2 + $0x8] sm:$0xff] %v800_v1 }
  0xd2 PF: > { %v851_v2 = vld [vmem:[%s5808_s17 + $0x170] sm:$0xff]  ;;  %v850_v3 = vld [vmem:[%s5808_s17 + $0x168] sm:$0xff]  ;;  %v848_v4 = vld [vmem:[%s5808_s17 + $0x158] sm:$0xff]  ;;  %v5514_v6 = vmov 0.0   ;;  %vm5515_vm0 = vmmov 0   ;;  %v855_v37 = vlaneseq  ;;  %vm1022_vm1 = vcmask 130048  }
  0xd3   : > { %870 = vmatprep.subr.mxu0 %v851_v2  ;;  %v847_v5 = vld [vmem:[%s5808_s17 + $0x150] sm:$0xff]  ;;  %934 = vmatprep.mubr.f32.mxu0 %v5514_v6  ;;  %v845_v7 = vld [vmem:[%s5808_s17 + $0x140] sm:$0xff]  ;;  %v844_v8 = vld [vmem:[%s5808_s17 + $0x138] sm:$0xff]  ;;  %s5516_s0 = smov 112   ;;  %vm1177_vm2 = vcmask 64512   ;;  %s5517_s2 = smov 96  }
  0xd4   : > { %871 = vmatpush1.msra.mxu0 %v850_v3  ;;  %v842_v9 = vld [vmem:[%s5808_s17 + $0x128] sm:$0xff]  ;;  %v841_v10 = vld [vmem:[%s5808_s17 + $0x120] sm:$0xff]  ;;  %v839_v11 = vld [vmem:[%s5808_s17 + $0x110] sm:$0xff]  ;;  %v5903_v38 = vshrl.u32 %v855_v37, 7  ;;  %s5520_s11 = smov 48   ;;  %s5521_s22 = smov 32  }
  0xd5   : > { %872 = vmatprep.subr.mxu0 %v848_v4  ;;  %v838_v12 = vld [vmem:[%s5808_s17 + $0x108] sm:$0xff]  ;;  %v836_v13 = vld [vmem:[%s5808_s17 + $0xf8] sm:$0xff]  ;;  %v835_v14 = vld [vmem:[%s5808_s17 + $0xf0] sm:$0xff]  ;;  %s5522_s19 = smov 16   ;;  %vm3730_vm3 = vcmask 261120   ;;  %vm3733_vm4 = vcmask 392192  }
  0xd6   : > { %873 = vmatpush1.msra.mxu0 %v847_v5  ;;  %v833_v15 = vld [vmem:[%s5808_s17 + $0xe0] sm:$0xff]  ;;  %v832_v17 = vld [vmem:[%s5808_s17 + $0xd8] sm:$0xff]  ;;  %v830_v18 = vld [vmem:[%s5808_s17 + $0xc8] sm:$0xff]  ;;  %v857_v39 = vsub.s32 0, %v5903_v38  ;;  %v861_v41 = vsub.s32 1, %v5903_v38  ;;  %vm3736_vm5 = vcmask 523264  }
  0xd7   : > { %874 = vmatprep.subr.mxu0 %v845_v7  ;;  %v829_v19 = vld [vmem:[%s5808_s17 + $0xc0] sm:$0xff]  ;;  %v827_v20 = vld [vmem:[%s5808_s17 + $0xb0] sm:$0xff]  ;;  %v826_v21 = vld [vmem:[%s5808_s17 + $0xa8] sm:$0xff]  ;;  %vm3739_vm6 = vcmask 654336   ;;  %vm3742_vm7 = vcmask 785408   ;;  %vm3745_vm8 = vcmask 916480  }
  0xd8   : > { %875 = vmatpush1.msra.mxu0 %v844_v8  ;;  %v803_v16 = vld [vmem:[#allocation2] sm:$0xff]  ;;  %v824_v22 = vld [vmem:[%s5808_s17 + $0x98] sm:$0xff]  ;;  %v823_v23 = vld [vmem:[%s5808_s17 + $0x90] sm:$0xff] }
  0xd9   : > { %876 = vmatprep.subr.mxu0 %v842_v9  ;;  %4717 = vmatprep.mubr.f32.mxu1 %v803_v16  ;;  %v821_v24 = vld [vmem:[%s5808_s17 + $0x80] sm:$0xff]  ;;  %v820_v25 = vld [vmem:[%s5808_s17 + $0x78] sm:$0xff]  ;;  %v818_v26 = vld [vmem:[%s5808_s17 + $0x68] sm:$0xff] }
  0xda   : > { %877 = vmatpush1.msra.mxu0 %v841_v10  ;;  %v817_v27 = vld [vmem:[%s5808_s17 + $0x60] sm:$0xff]  ;;  %v815_v28 = vld [vmem:[%s5808_s17 + $0x50] sm:$0xff]  ;;  %v814_v29 = vld [vmem:[%s5808_s17 + $0x48] sm:$0xff] }
  0xdb   : > { %878 = vmatprep.subr.mxu0 %v839_v11  ;;  %v812_v30 = vld [vmem:[%s5808_s17 + $0x38] sm:$0xff]  ;;  %v811_v31 = vld [vmem:[%s5808_s17 + $0x30] sm:$0xff]  ;;  %v809_v32 = vld [vmem:[%s5808_s17 + $0x20] sm:$0xff] }
  0xdc   : > { %879 = vmatpush1.msra.mxu0 %v838_v12  ;;  %v808_v33 = vld [vmem:[%s5808_s17 + $0x18] sm:$0xff]  ;;  %v806_v34 = vld [vmem:[%s5808_s17 + $0x8] sm:$0xff]  ;;  %v805_v35 = vld [vmem:[%s5808_s17] sm:$0xff] }
  0xdd   : > { %880 = vmatprep.subr.mxu0 %v836_v13  ;;  %v5898_v36 = vld [vmem:[#allocation2 + $0x8] sm:$0xff]  ;;  %v5907_v40 = vld [vmem:[%s5816_s4] sm:$0x7]  ;;  %v852_v52 = vld [vmem:[%s5808_s17 + $0x178] sm:$0xff]  ;;  %s5519_s4 = smov 64  }
  0xde   : > { %881 = vmatpush1.msra.mxu0 %v835_v14  ;;  %v858_v42 = vrot.slane %v5907_v40, %v857_v39  ;;  %v862_v43 = vrot.slane %v5907_v40, %v861_v41  ;;  %v849_v53 = vld [vmem:[%s5808_s17 + $0x160] sm:$0xff]  ;;  %4685 = vmatprep.subr.mxu1 %v852_v52  ;;  %v846_v54 = vld [vmem:[%s5808_s17 + $0x148] sm:$0xff]  ;;  %v843_v55 = vld [vmem:[%s5808_s17 + $0x130] sm:$0xff] }
  0xdf   : > { %882 = vmatprep.subr.mxu0 %v833_v15  ;;  %4686 = vmatpush3.msra.mxu1 %v852_v52  ;;  %v840_v56 = vld [vmem:[%s5808_s17 + $0x118] sm:$0xff]  ;;  %v837_v57 = vld [vmem:[%s5808_s17 + $0x100] sm:$0xff]  ;;  %v834_v58 = vld [vmem:[%s5808_s17 + $0xe8] sm:$0xff] }
  0xe0   : > { %883 = vmatpush1.msra.mxu0 %v832_v17  ;;  %4687 = vmatprep.subr.mxu1 %v849_v53  ;;  %v831_v59 = vld [vmem:[%s5808_s17 + $0xd0] sm:$0xff]  ;;  %v828_v60 = vld [vmem:[%s5808_s17 + $0xb8] sm:$0xff]  ;;  %v825_v61 = vld [vmem:[%s5808_s17 + $0xa0] sm:$0xff] }
  0xe1   : > { %884 = vmatprep.subr.mxu0 %v830_v18  ;;  %4688 = vmatpush3.msra.mxu1 %v849_v53  ;;  %v822_v62 = vld [vmem:[%s5808_s17 + $0x88] sm:$0xff]  ;;  %v819_v63 = vld [vmem:[%s5808_s17 + $0x70] sm:$0xff]  ;;  %v816_v0 = vld [vmem:[%s5808_s17 + $0x58] sm:$0xff] }
  0xe2   : > { %885 = vmatpush1.msra.mxu0 %v829_v19  ;;  %4689 = vmatprep.subr.mxu1 %v846_v54  ;;  %v813_v1 = vld [vmem:[%s5808_s17 + $0x40] sm:$0xff]  ;;  %v810_v2 = vld [vmem:[%s5808_s17 + $0x28] sm:$0xff]  ;;  %v807_v3 = vld [vmem:[%s5808_s17 + $0x10] sm:$0xff]  ;;  %s5518_s17 = smov 80  }
  0xe3   : > { %886 = vmatprep.subr.mxu0 %v827_v20  ;;  %4690 = vmatpush3.msra.mxu1 %v846_v54 }
  0xe4   : > { %887 = vmatpush1.msra.mxu0 %v826_v21  ;;  %4691 = vmatprep.subr.mxu1 %v843_v55 }
  0xe5   : > { %888 = vmatprep.subr.mxu0 %v824_v22  ;;  %4692 = vmatpush3.msra.mxu1 %v843_v55 }
  0xe6   : > { %889 = vmatpush1.msra.mxu0 %v823_v23  ;;  %4693 = vmatprep.subr.mxu1 %v840_v56  ;;  %v865_v23 = vsub.s32 2, %v5903_v38  ;;  %v4536_v38 = vld [vmem:[%s791_s15] ss:$0 sm:$0xff] }
  0xe7   : > { %890 = vmatprep.subr.mxu0 %v821_v24  ;;  %4694 = vmatpush3.msra.mxu1 %v840_v56 }
  0xe8   : > { %891 = vmatpush1.msra.mxu0 %v820_v25  ;;  %4695 = vmatprep.subr.mxu1 %v837_v57  ;;  %v866_v25 = vrot.slane %v5907_v40, %v865_v23 }
  0xe9   : > { %892 = vmatprep.subr.mxu0 %v818_v26  ;;  %4696 = vmatpush3.msra.mxu1 %v837_v57 }
  0xea   : > { %893 = vmatpush1.msra.mxu0 %v817_v27  ;;  %4697 = vmatprep.subr.mxu1 %v834_v58 }
  0xeb   : > { %894 = vmatprep.subr.mxu0 %v815_v28  ;;  %4698 = vmatpush3.msra.mxu1 %v834_v58 }
  0xec   : > { %895 = vmatpush1.msra.mxu0 %v814_v29  ;;  %4699 = vmatprep.subr.mxu1 %v831_v59 }
  0xed   : > { %896 = vmatprep.subr.mxu0 %v812_v30  ;;  %4700 = vmatpush3.msra.mxu1 %v831_v59 }
  0xee   : > { %897 = vmatpush1.msra.mxu0 %v811_v31  ;;  %4701 = vmatprep.subr.mxu1 %v828_v60 }
  0xef   : > { %898 = vmatprep.subr.mxu0 %v809_v32  ;;  %4702 = vmatpush3.msra.mxu1 %v828_v60 }
  0xf0   : > { %899 = vmatpush1.msra.mxu0 %v808_v33  ;;  %4703 = vmatprep.subr.mxu1 %v825_v61 }
  0xf1   : > { %900 = vmatprep.subr.mxu0 %v806_v34  ;;  %4704 = vmatpush3.msra.mxu1 %v825_v61 }
  0xf2   : > { %901 = vmatpush1.msra.mxu0 %v805_v35  ;;  %4705 = vmatprep.subr.mxu1 %v822_v62 }
  0xf3   : > { %935 = vmatmul.mubr.f32.vlgmr.msra.gmra.mxu0 %v803_v16  ;;  %4720 = vmatprep.subr.mxu0 %v5514_v6 }
  0xf4   : > { %940 = vmatprep.mubr.f32.mxu0 %v5514_v6  ;;  %4706 = vmatpush3.msra.mxu1 %v822_v62 }
  0xf5   : > { %4707 = vmatprep.subr.mxu1 %v819_v63 }
  0xf6   : > { %4708 = vmatpush3.msra.mxu1 %v819_v63 }
  0xf7   : > { %941 = vmatmul.mubr.f32.gmra.mxu0 %v5898_v36  ;;  %4709 = vmatprep.subr.mxu1 %v816_v0 }
  0xf8   : > { %4722 = vmatprep.mubr.msk.f32.mxu0 %vm5515_vm0, %v5514_v6  ;;  %4710 = vmatpush3.msra.mxu1 %v816_v0 }
  0xf9   : > { %4711 = vmatprep.subr.mxu1 %v813_v1 }
  0xfa   : > { %4712 = vmatpush3.msra.mxu1 %v813_v1 }
  0xfb   : > { %4713 = vmatprep.subr.mxu1 %v810_v2 }
  0xfc   : > { %4714 = vmatpush3.msra.mxu1 %v810_v2 }
  0xfd   : > { %4715 = vmatprep.subr.mxu1 %v807_v3 }
  0xfe   : > { %4716 = vmatpush3.msra.mxu1 %v807_v3 }
  0xff   : > { %4718 = vmatmul.mubr.f32.vlgmr.msra.gmra.mxu1 %v5898_v36  ;;  %4750 = vmatprep.subr.mxu1 %v5514_v6 }
 0x100   : > { %4752 = vmatprep.mubr.msk.f32.mxu1 %vm5515_vm0, %v5514_v6 }
 0x1b3   : > { %v936_v44 = vpop.f32.mrf.mxu0 }
 0x1b4   : > { %v5916_v45 = vadd.f32 %v936_v44, %v858_v42 }
 0x1b5   : > { %v938_v46 = vpop.f32.mrf.mxu0 }
 0x1b6   : > { %v5918_v47 = vadd.f32 %v938_v46, %v862_v43  ;;  %1346 = vrot.lane.b32.xlu1 %v5916_v45, %s5516_s0 }
 0x1b7   : > { %v942_v48 = vpop.f32.mrf.mxu0 }
 0x1b8   : > { %4721 = vmatpush3.xpose.msk.msra.mxu0 %vm1022_vm1, %v5918_v47  ;;  %v5933_v51 = vadd.f32 %v942_v48, %v858_v42 }
 0x1b9   : > { %v944_v49 = vpop.f32.mrf.mxu0  ;;  %4725 = vmatprep.subr.mxu0 %v5514_v6 }
 0x1ba   : > { %v5925_v50 = vadd.f32 %v944_v49, %v862_v43 }
 0x1bb   : > { %4723 = vmatmul.mubr.msk.f32.vlgmr.msra.gmra.mxu0 %vm1022_vm1, %v5916_v45 }
 0x1bc   : > { %4726 = vmatpush3.xpose.msk.msra.mxu0 %vm1022_vm1, %v5925_v50  ;;  %1426 = vrot.lane.b32.xlu1 %v5925_v50, %s5516_s0 }
 0x1bd   : > { %4727 = vmatprep.mubr.msk.f32.mxu0 %vm5515_vm0, %v5514_v6  ;;  %4730 = vmatprep.subr.mxu0 %v5514_v6 }
 0x1bf   : > { %4728 = vmatmul.mubr.msk.f32.vlgmr.msra.gmra.mxu0 %vm1022_vm1, %v5933_v51  ;;  %v4719_v24 = vpop.f32.mrf.mxu1 }
 0x1c0   : > { %4732 = vmatprep.mubr.msk.f32.mxu0 %vm5515_vm0, %v5514_v6  ;;  %v5972_v27 = vadd.f32 %v4719_v24, %v866_v25 }
 0x1c1   : > { %v1013_v26 = vpop.f32.mrf.mxu1 }
 0x1c2   : > { %v5974_v28 = vadd.f32 %v1013_v26, %v866_v25 }
 0x1c4   : > { %4731 = vmatpush3.msra.mxu0 %v5974_v28 }
 0x1c5   : > { %4735 = vmatprep.subr.mxu0 %v5514_v6 }
 0x228   : > { %v1347_v29 = vpop.permute.xlu1 %1346 }
 0x22e   : > { %v1427_v30 = vpop.permute.xlu1 %1426 }
 0x27b   : > { %v1095_v4 = vpop.f32.mrf.mxu0 }
 0x27c   : > { %v1175_v5 = vmul.f32 0.25, %v1095_v4 }
 0x27d   : > { %v4724_v7 = vpop.f32.mrf.mxu0 }
 0x27e   : > { %v1178_v8 = vsel %vm1177_vm2, %v1175_v5, -inf }
 0x27f   : > { %1179 = vmax.xlane.f32.xlu0 %v1178_v8  ;;  %v1171_v9 = vpop.f32.mrf.mxu0 }
 0x280   : > { %v1176_v10 = vmul.f32 0.25, %v1171_v9 }
 0x281   : > { %v4729_v11 = vpop.f32.mrf.mxu0 }
 0x282   : > { %v1181_v12 = vsel %vm1177_vm2, %v1176_v10, -inf }
 0x283   : > { %1182 = vmax.xlane.f32.xlu0 %v1181_v12 }
 0x299   : > { %1348 = vrot.lane.b32.xlu0 %v5918_v47, %s5516_s0 }
 0x308   : > { %v1180_v13 = vpop.xlane.xlu0 %1179 }
 0x309   : > { %v1184_v14 = vsub.f32 %v1175_v5, %v1180_v13 }
 0x30b   : > { %v1186_v15 = vmul.f32 1.442695, %v1184_v14 }
 0x30c   : > { %v1183_v16 = vpop.xlane.xlu0 %1182 }
 0x30d   : > { %5079 = vpow2.f32 %v1186_v15  ;;  %v1185_v17 = vsub.f32 %v1176_v10, %v1183_v16 }
 0x30f   : > { %v1188_v18 = vmul.f32 1.442695, %v1185_v17 }
 0x310   : > { %v1349_v37 = vpop.permute.xlu0 %1348 }
 0x311   : > { %5081 = vpow2.f32 %v1188_v18 }
 0x31a   : > { %v5080_v19 = vpop.eup %5079 }
 0x31b   : > { %v1190_v20 = vsel %vm1177_vm2, %v5080_v19, 0.0 }
 0x31c   : > { %1191 = vadd.xlane.f32.xlu1 %v1190_v20 }
 0x31e   : > { %v5082_v21 = vpop.eup %5081 }
 0x31f   : > { %v1193_v22 = vsel %vm1177_vm2, %v5082_v21, 0.0 }
 0x320   : > { %1194 = vadd.xlane.f32.xlu1 %v1193_v22 }
 0x331   : > { %1424 = vrot.lane.b32.xlu1 %v5933_v51, %s5516_s0 }
 0x3a5   : > { %v1192_v31 = vpop.xlane.xlu1 %1191 }
 0x3a6   : > { %5083 = vrcp.f32 %v1192_v31 }
 0x3a9   : > { %v1195_v32 = vpop.xlane.xlu1 %1194 }
 0x3aa   : > { %5085 = vrcp.f32 %v1195_v32 }
 0x3ad   : > { %v1425_v40 = vpop.permute.xlu1 %1424 }
 0x3b3   : > { %v5084_v33 = vpop.eup %5083 }
 0x3b4   : > { %v1198_v34 = vmul.f32 %v5084_v33, %v5080_v19 }
 0x3b6   : > { %4733 = vmatmul.mubr.msk.f32.vlgmr.msra.gmra.mxu0 %vm1177_vm2, %v1198_v34 }
 0x3b7   : > { %v5086_v35 = vpop.eup %5085  ;;  %4736 = vmatpush3.msra.mxu0 %v5972_v27  ;;  %4737 = vmatprep.mubr.msk.f32.mxu0 %vm5515_vm0, %v5514_v6 }
 0x3b8   : > { %4740 = vmatprep.subr.mxu0 %v5514_v6  ;;  %v1199_v36 = vmul.f32 %v5086_v35, %v5082_v21 }
 0x3ba   : > { %4738 = vmatmul.mubr.msk.f32.vlgmr.msra.gmra.mxu0 %vm1177_vm2, %v1199_v36 }
 0x3bb   : > { %4741 = vmatpush3.xpose.msk.msra.mxu0 %vm1022_vm1, %v1349_v37  ;;  %4742 = vmatprep.mubr.msk.f32.mxu0 %vm5515_vm0, %v5514_v6 }
 0x3bc   : > { %4745 = vmatprep.subr.mxu0 %v5514_v6 }
 0x3be   : > { %4743 = vmatmul.mubr.msk.f32.vlgmr.msra.gmra.mxu0 %vm1022_vm1, %v1347_v29 }
 0x3bf   : > { %4746 = vmatpush3.xpose.msk.msra.mxu0 %vm1022_vm1, %v1427_v30  ;;  %4747 = vmatprep.mubr.msk.f32.mxu0 %vm5515_vm0, %v5514_v6 }
 0x3c0   : > { %4755 = vmatprep.subr.mxu0 %v5514_v6 }
 0x3c2   : > { %4748 = vmatmul.mubr.msk.f32.vlgmr.msra.gmra.mxu0 %vm1022_vm1, %v1425_v40 }
 0x3c3   : > { %4757 = vmatprep.mubr.msk.f32.mxu0 %vm5515_vm0, %v5514_v6 }
 0x476   : > { %v5996_v42 = vpop.f32.mrf.mxu0 }
 0x478   : > { %v4734_v43 = vpop.f32.mrf.mxu0 }
 0x47a   : > { %v5998_v44 = vpop.f32.mrf.mxu0 }
 0x47c   : > { %v4739_v46 = vpop.f32.mrf.mxu0 }
 0x47e   : > { %v1420_v48 = vpop.f32.mrf.mxu0 }
 0x47f   : > { %v1502_v49 = vmul.f32 0.25, %v1420_v48 }
 0x480   : > { %v4744_v52 = vpop.f32.mrf.mxu0 }
 0x481   : > { %v1504_v53 = vsel %vm1177_vm2, %v1502_v49, -inf }
 0x482   : > { %1505 = vmax.xlane.f32.xlu0 %v1504_v53  ;;  %v1498_v54 = vpop.f32.mrf.mxu0 }
 0x483   : > { %v1503_v55 = vmul.f32 0.25, %v1498_v54 }
 0x484   : > { %v4749_v56 = vpop.f32.mrf.mxu0 }
 0x485   : > { %v1507_v57 = vsel %vm1177_vm2, %v1503_v55, -inf }
 0x486   : > { %1508 = vmax.xlane.f32.xlu1 %v1507_v57 }
 0x497   : > { %1604 = vrot.lane.b32.xlu1 %v5972_v27, %s5516_s0 }
 0x498   : > { %1527 = vrot.lane.b32.xlu0 %v5974_v28, %s5516_s0 }
 0x49b   : > { %1682 = vrot.lane.b32.xlu1 %v5918_v47, %s5517_s2 }
 0x49f   : > { %1760 = vrot.lane.b32.xlu1 %v5925_v50, %s5517_s2 }
 0x4a3   : > { %1758 = vrot.lane.b32.xlu1 %v5933_v51, %s5517_s2 }
 0x50b   : > { %v1506_v58 = vpop.xlane.xlu0 %1505 }
 0x50c   : > { %v1510_v59 = vsub.f32 %v1502_v49, %v1506_v58 }
 0x50e   : > { %v1512_v60 = vmul.f32 1.442695, %v1510_v59 }
 0x50f   : > { %v1528_v61 = vpop.permute.xlu0 %1527  ;;  %v1509_v62 = vpop.xlane.xlu1 %1508 }
 0x510   : > { %5087 = vpow2.f32 %v1512_v60  ;;  %v1511_v63 = vsub.f32 %v1503_v55, %v1509_v62  ;;  %4751 = vmatpush3.msra.mxu1 %v1528_v61 }
 0x511   : > { %4760 = vmatprep.subr.mxu1 %v5514_v6 }
 0x512   : > { %v1514_v0 = vmul.f32 1.442695, %v1511_v63 }
 0x513   : > { %v1605_v1 = vpop.permute.xlu1 %1604 }
 0x514   : > { %5089 = vpow2.f32 %v1514_v0  ;;  %4756 = vmatpush3.msra.mxu0 %v1605_v1 }
 0x515   : > { %4765 = vmatprep.subr.mxu0 %v5514_v6 }
 0x517   : > { %v1683_v9 = vpop.permute.xlu1 %1682 }
 0x51b   : > { %v1761_v13 = vpop.permute.xlu1 %1760 }
 0x51d   : > { %v5088_v2 = vpop.eup %5087 }
 0x51e   : > { %v1516_v3 = vsel %vm1177_vm2, %v5088_v2, 0.0 }
 0x51f   : > { %1517 = vadd.xlane.f32.xlu0 %v1516_v3  ;;  %v1759_v16 = vpop.permute.xlu1 %1758 }
 0x521   : > { %v5090_v4 = vpop.eup %5089 }
 0x522   : > { %v1519_v5 = vsel %vm1177_vm2, %v5090_v4, 0.0 }
 0x523   : > { %1520 = vadd.xlane.f32.xlu0 %v1519_v5 }
 0x539   : > { %1680 = vrot.lane.b32.xlu0 %v5916_v45, %s5517_s2 }
 0x5a8   : > { %v1518_v7 = vpop.xlane.xlu0 %1517 }
 0x5a9   : > { %5091 = vrcp.f32 %v1518_v7 }
 0x5ac   : > { %v1521_v8 = vpop.xlane.xlu0 %1520 }
 0x5ad   : > { %5093 = vrcp.f32 %v1521_v8 }
 0x5b0   : > { %v1681_v15 = vpop.permute.xlu0 %1680 }
 0x5b6   : > { %v5092_v10 = vpop.eup %5091 }
 0x5b7   : > { %v1524_v11 = vmul.f32 %v5092_v10, %v5088_v2 }
 0x5b9   : > { %4753 = vmatmul.mubr.msk.f32.vlgmr.msra.gmra.mxu1 %vm1177_vm2, %v1524_v11 }
 0x5ba   : > { %v5094_v12 = vpop.eup %5093  ;;  %4761 = vmatpush3.xpose.msk.msra.mxu1 %vm1022_vm1, %v1683_v9  ;;  %4762 = vmatprep.mubr.msk.f32.mxu1 %vm5515_vm0, %v5514_v6 }
 0x5bb   : > { %v1525_v14 = vmul.f32 %v5094_v12, %v5090_v4  ;;  %4770 = vmatprep.subr.mxu1 %v5514_v6 }
 0x5bd   : > { %4758 = vmatmul.mubr.msk.f32.vlgmr.msra.gmra.mxu0 %vm1177_vm2, %v1525_v14  ;;  %4763 = vmatmul.mubr.msk.f32.vlgmr.msra.gmra.mxu1 %vm1022_vm1, %v1681_v15 }
 0x5be   : > { %4766 = vmatpush3.xpose.msk.msra.mxu0 %vm1022_vm1, %v1761_v13  ;;  %4767 = vmatprep.mubr.msk.f32.mxu0 %vm5515_vm0, %v5514_v6 }
 0x5bf   : > { %4775 = vmatprep.subr.mxu0 %v5514_v6  ;;  %4772 = vmatprep.mubr.msk.f32.mxu1 %vm5515_vm0, %v5514_v6 }
 0x5c1   : > { %4768 = vmatmul.mubr.msk.f32.vlgmr.msra.gmra.mxu0 %vm1022_vm1, %v1759_v16 }
 0x5c2   : > { %4777 = vmatprep.mubr.msk.f32.mxu0 %vm5515_vm0, %v5514_v6 }
 0x679   : > { %v6034_v17 = vpop.f32.mrf.mxu1 }
 0x67b   : > { %v4754_v18 = vpop.f32.mrf.mxu1 }
 0x67d   : > { %v6036_v19 = vpop.f32.mrf.mxu0  ;;  %v1754_v20 = vpop.f32.mrf.mxu1 }
 0x67e   : > { %v5044_v21 = vpack.i.bf16 %v6036_v19, %v6034_v17  ;;  %v1836_v22 = vmul.f32 0.25, %v1754_v20 }
 0x67f   : > { %v4759_v23 = vpop.f32.mrf.mxu0  ;;  %v4764_v24 = vpop.f32.mrf.mxu1 }
 0x680   : > { %v1838_v25 = vsel %vm1177_vm2, %v1836_v22, -inf }
 0x681   : > { %1839 = vmax.xlane.f32.xlu0 %v1838_v25  ;;  %v1832_v26 = vpop.f32.mrf.mxu0 }
 0x682   : > { %v1837_v29 = vmul.f32 0.25, %v1832_v26 }
 0x683   : > { %v4769_v30 = vpop.f32.mrf.mxu0 }
 0x684   : > { %v1841_v31 = vsel %vm1177_vm2, %v1837_v29, -inf }
 0x685   : > { %1842 = vmax.xlane.f32.xlu1 %v1841_v31 }
 0x696   : > { %1936 = vrot.lane.b32.xlu1 %v5972_v27, %s5517_s2 }
 0x697   : > { %1860 = vrot.lane.b32.xlu0 %v5974_v28, %s5517_s2 }
 0x69a   : > { %2014 = vrot.lane.b32.xlu1 %v5918_v47, %s5518_s17 }
 0x69e   : > { %2092 = vrot.lane.b32.xlu1 %v5925_v50, %s5518_s17 }
 0x6a2   : > { %2090 = vrot.lane.b32.xlu1 %v5933_v51, %s5518_s17 }
 0x70a   : > { %v1840_v32 = vpop.xlane.xlu0 %1839 }
 0x70b   : > { %v1844_v33 = vsub.f32 %v1836_v22, %v1840_v32 }
 0x70d   : > { %v1846_v34 = vmul.f32 1.442695, %v1844_v33 }
 0x70e   : > { %v1861_v35 = vpop.permute.xlu0 %1860  ;;  %v1843_v36 = vpop.xlane.xlu1 %1842 }
 0x70f   : > { %5095 = vpow2.f32 %v1846_v34  ;;  %v1845_v37 = vsub.f32 %v1837_v29, %v1843_v36  ;;  %4771 = vmatpush3.msra.mxu1 %v1861_v35 }
 0x710   : > { %4780 = vmatprep.subr.mxu1 %v5514_v6 }
 0x711   : > { %v1848_v40 = vmul.f32 1.442695, %v1845_v37 }
 0x712   : > { %v1937_v43 = vpop.permute.xlu1 %1936 }
 0x713   : > { %5097 = vpow2.f32 %v1848_v40  ;;  %4776 = vmatpush3.msra.mxu0 %v1937_v43 }
 0x714   : > { %4785 = vmatprep.subr.mxu0 %v5514_v6 }
 0x716   : > { %v2015_v55 = vpop.permute.xlu1 %2014 }
 0x71a   : > { %v2093_v59 = vpop.permute.xlu1 %2092 }
 0x71c   : > { %v5096_v46 = vpop.eup %5095 }
 0x71d   : > { %v1850_v48 = vsel %vm1177_vm2, %v5096_v46, 0.0 }
 0x71e   : > { %1851 = vadd.xlane.f32.xlu0 %v1850_v48  ;;  %v2091_v62 = vpop.permute.xlu1 %2090 }
 0x720   : > { %v5098_v49 = vpop.eup %5097 }
 0x721   : > { %v1853_v52 = vsel %vm1177_vm2, %v5098_v49, 0.0 }
 0x722   : > { %1854 = vadd.xlane.f32.xlu0 %v1853_v52 }
 0x738   : > { %2012 = vrot.lane.b32.xlu0 %v5916_v45, %s5518_s17 }
 0x7a7   : > { %v1852_v53 = vpop.xlane.xlu0 %1851 }
 0x7a8   : > { %5099 = vrcp.f32 %v1852_v53 }
 0x7ab   : > { %v1855_v54 = vpop.xlane.xlu0 %1854 }
 0x7ac   : > { %5101 = vrcp.f32 %v1855_v54 }
 0x7af   : > { %v2013_v61 = vpop.permute.xlu0 %2012 }
 0x7b5   : > { %v5100_v56 = vpop.eup %5099 }
 0x7b6   : > { %v1858_v57 = vmul.f32 %v5100_v56, %v5096_v46 }
 0x7b8   : > { %4773 = vmatmul.mubr.msk.f32.vlgmr.msra.gmra.mxu1 %vm1177_vm2, %v1858_v57 }
 0x7b9   : > { %v5102_v58 = vpop.eup %5101  ;;  %4781 = vmatpush3.xpose.msk.msra.mxu1 %vm1022_vm1, %v2015_v55  ;;  %4782 = vmatprep.mubr.msk.f32.mxu1 %vm5515_vm0, %v5514_v6 }
 0x7ba   : > { %v1859_v60 = vmul.f32 %v5102_v58, %v5098_v49  ;;  %4790 = vmatprep.subr.mxu1 %v5514_v6 }
 0x7bc   : > { %4778 = vmatmul.mubr.msk.f32.vlgmr.msra.gmra.mxu0 %vm1177_vm2, %v1859_v60  ;;  %4783 = vmatmul.mubr.msk.f32.vlgmr.msra.gmra.mxu1 %vm1022_vm1, %v2013_v61 }
 0x7bd   : > { %4786 = vmatpush3.xpose.msk.msra.mxu0 %vm1022_vm1, %v2093_v59  ;;  %4787 = vmatprep.mubr.msk.f32.mxu0 %vm5515_vm0, %v5514_v6 }
 0x7be   : > { %4795 = vmatprep.subr.mxu0 %v5514_v6  ;;  %4792 = vmatprep.mubr.msk.f32.mxu1 %vm5515_vm0, %v5514_v6 }
 0x7c0   : > { %4788 = vmatmul.mubr.msk.f32.vlgmr.msra.gmra.mxu0 %vm1022_vm1, %v2091_v62 }
 0x7c1   : > { %4797 = vmatprep.mubr.msk.f32.mxu0 %vm5515_vm0, %v5514_v6 }
 0x878   : > { %v6074_v63 = vpop.f32.mrf.mxu1 }
 0x87a   : > { %v4774_v0 = vpop.f32.mrf.mxu1 }
 0x87c   : > { %v6076_v1 = vpop.f32.mrf.mxu0  ;;  %v2086_v2 = vpop.f32.mrf.mxu1 }
 0x87d   : > { %v5049_v3 = vpack.i.bf16 %v6076_v1, %v6074_v63  ;;  %v2168_v4 = vmul.f32 0.25, %v2086_v2 }
 0x87e   : > { %v4779_v5 = vpop.f32.mrf.mxu0  ;;  %v4784_v7 = vpop.f32.mrf.mxu1 }
 0x87f   : > { %v2170_v8 = vsel %vm1177_vm2, %v2168_v4, -inf }
 0x880   : > { %2171 = vmax.xlane.f32.xlu0 %v2170_v8  ;;  %v2164_v9 = vpop.f32.mrf.mxu0 }
 0x881   : > { %v2169_v10 = vmul.f32 0.25, %v2164_v9 }
 0x882   : > { %v4789_v11 = vpop.f32.mrf.mxu0 }
 0x883   : > { %v2173_v12 = vsel %vm1177_vm2, %v2169_v10, -inf }
 0x884   : > { %2174 = vmax.xlane.f32.xlu1 %v2173_v12 }
 0x895   : > { %2268 = vrot.lane.b32.xlu1 %v5972_v27, %s5518_s17 }
 0x896   : > { %2192 = vrot.lane.b32.xlu0 %v5974_v28, %s5518_s17 }
 0x899   : > { %2346 = vrot.lane.b32.xlu1 %v5918_v47, %s5519_s4 }
 0x89d   : > { %2424 = vrot.lane.b32.xlu1 %v5925_v50, %s5519_s4 }
 0x8a1   : > { %2422 = vrot.lane.b32.xlu1 %v5933_v51, %s5519_s4 }
 0x909   : > { %v2172_v13 = vpop.xlane.xlu0 %2171 }
 0x90a   : > { %v2176_v14 = vsub.f32 %v2168_v4, %v2172_v13 }
 0x90c   : > { %v2178_v15 = vmul.f32 1.442695, %v2176_v14 }
 0x90d   : > { %v2193_v16 = vpop.permute.xlu0 %2192  ;;  %v2175_v18 = vpop.xlane.xlu1 %2174 }
 0x90e   : > { %5103 = vpow2.f32 %v2178_v15  ;;  %v2177_v20 = vsub.f32 %v2169_v10, %v2175_v18  ;;  %4791 = vmatpush3.msra.mxu1 %v2193_v16 }
 0x90f   : > { %4800 = vmatprep.subr.mxu1 %v5514_v6 }
 0x910   : > { %v2180_v22 = vmul.f32 1.442695, %v2177_v20 }
 0x911   : > { %v2269_v23 = vpop.permute.xlu1 %2268 }
 0x912   : > { %5105 = vpow2.f32 %v2180_v22  ;;  %4796 = vmatpush3.msra.mxu0 %v2269_v23 }
 0x913   : > { %4805 = vmatprep.subr.mxu0 %v5514_v6 }
 0x915   : > { %v2347_v32 = vpop.permute.xlu1 %2346 }
 0x919   : > { %v2425_v36 = vpop.permute.xlu1 %2424 }
 0x91b   : > { %v5104_v24 = vpop.eup %5103 }
 0x91c   : > { %v2182_v25 = vsel %vm1177_vm2, %v5104_v24, 0.0 }
 0x91d   : > { %2183 = vadd.xlane.f32.xlu0 %v2182_v25  ;;  %v2423_v43 = vpop.permute.xlu1 %2422 }
 0x91f   : > { %v5106_v26 = vpop.eup %5105 }
 0x920   : > { %v2185_v29 = vsel %vm1177_vm2, %v5106_v26, 0.0 }
 0x921   : > { %2186 = vadd.xlane.f32.xlu0 %v2185_v29 }
 0x937   : > { %2344 = vrot.lane.b32.xlu0 %v5916_v45, %s5519_s4 }
 0x9a6   : > { %v2184_v30 = vpop.xlane.xlu0 %2183 }
 0x9a7   : > { %5107 = vrcp.f32 %v2184_v30 }
 0x9aa   : > { %v2187_v31 = vpop.xlane.xlu0 %2186 }
 0x9ab   : > { %5109 = vrcp.f32 %v2187_v31 }
 0x9ae   : > { %v2345_v40 = vpop.permute.xlu0 %2344 }
 0x9b4   : > { %v5108_v33 = vpop.eup %5107 }
 0x9b5   : > { %v2190_v34 = vmul.f32 %v5108_v33, %v5104_v24 }
 0x9b7   : > { %4793 = vmatmul.mubr.msk.f32.vlgmr.msra.gmra.mxu1 %vm1177_vm2, %v2190_v34 }
 0x9b8   : > { %v5110_v35 = vpop.eup %5109  ;;  %4801 = vmatpush3.xpose.msk.msra.mxu1 %vm1022_vm1, %v2347_v32  ;;  %4802 = vmatprep.mubr.msk.f32.mxu1 %vm5515_vm0, %v5514_v6 }
 0x9b9   : > { %v2191_v37 = vmul.f32 %v5110_v35, %v5106_v26  ;;  %4810 = vmatprep.subr.mxu1 %v5514_v6 }
 0x9bb   : > { %4798 = vmatmul.mubr.msk.f32.vlgmr.msra.gmra.mxu0 %vm1177_vm2, %v2191_v37  ;;  %4803 = vmatmul.mubr.msk.f32.vlgmr.msra.gmra.mxu1 %vm1022_vm1, %v2345_v40 }
 0x9bc   : > { %4806 = vmatpush3.xpose.msk.msra.mxu0 %vm1022_vm1, %v2425_v36  ;;  %4807 = vmatprep.mubr.msk.f32.mxu0 %vm5515_vm0, %v5514_v6 }
 0x9bd   : > { %4815 = vmatprep.subr.mxu0 %v5514_v6  ;;  %4812 = vmatprep.mubr.msk.f32.mxu1 %vm5515_vm0, %v5514_v6 }
 0x9bf   : > { %4808 = vmatmul.mubr.msk.f32.vlgmr.msra.gmra.mxu0 %vm1022_vm1, %v2423_v43 }
 0x9c0   : > { %4817 = vmatprep.mubr.msk.f32.mxu0 %vm5515_vm0, %v5514_v6 }
 0xa77   : > { %v6114_v46 = vpop.f32.mrf.mxu1 }
 0xa79   : > { %v4794_v48 = vpop.f32.mrf.mxu1 }
 0xa7b   : > { %v6116_v49 = vpop.f32.mrf.mxu0  ;;  %v2418_v52 = vpop.f32.mrf.mxu1 }
 0xa7c   : > { %v5054_v53 = vpack.i.bf16 %v6116_v49, %v6114_v46  ;;  %v2500_v54 = vmul.f32 0.25, %v2418_v52 }
 0xa7d   : > { %v4799_v55 = vpop.f32.mrf.mxu0  ;;  %v4804_v56 = vpop.f32.mrf.mxu1 }
 0xa7e   : > { %v2502_v57 = vsel %vm1177_vm2, %v2500_v54, -inf }
 0xa7f   : > { %2503 = vmax.xlane.f32.xlu0 %v2502_v57  ;;  %v2496_v58 = vpop.f32.mrf.mxu0 }
 0xa80   : > { %v2501_v59 = vmul.f32 0.25, %v2496_v58 }
 0xa81   : > { %v4809_v60 = vpop.f32.mrf.mxu0 }
 0xa82   : > { %v2505_v61 = vsel %vm1177_vm2, %v2501_v59, -inf }
 0xa83   : > { %2506 = vmax.xlane.f32.xlu1 %v2505_v61 }
 0xa94   : > { %2600 = vrot.lane.b32.xlu1 %v5972_v27, %s5519_s4 }
 0xa95   : > { %2524 = vrot.lane.b32.xlu0 %v5974_v28, %s5519_s4 }
 0xa98   : > { %2678 = vrot.lane.b32.xlu1 %v5918_v47, %s5520_s11 }
 0xa9c   : > { %2756 = vrot.lane.b32.xlu1 %v5925_v50, %s5520_s11 }
 0xaa0   : > { %2754 = vrot.lane.b32.xlu1 %v5933_v51, %s5520_s11 }
 0xb08   : > { %v2504_v62 = vpop.xlane.xlu0 %2503 }
 0xb09   : > { %v2508_v0 = vsub.f32 %v2500_v54, %v2504_v62 }
 0xb0b   : > { %v2510_v2 = vmul.f32 1.442695, %v2508_v0 }
 0xb0c   : > { %v2525_v4 = vpop.permute.xlu0 %2524  ;;  %v2507_v5 = vpop.xlane.xlu1 %2506 }
 0xb0d   : > { %5111 = vpow2.f32 %v2510_v2  ;;  %v2509_v7 = vsub.f32 %v2501_v59, %v2507_v5  ;;  %4811 = vmatpush3.msra.mxu1 %v2525_v4 }
 0xb0e   : > { %4820 = vmatprep.subr.mxu1 %v5514_v6 }
 0xb0f   : > { %v2512_v8 = vmul.f32 1.442695, %v2509_v7 }
 0xb10   : > { %v2601_v9 = vpop.permute.xlu1 %2600 }
 0xb11   : > { %5113 = vpow2.f32 %v2512_v8  ;;  %4816 = vmatpush3.msra.mxu0 %v2601_v9 }
 0xb12   : > { %4825 = vmatprep.subr.mxu0 %v5514_v6 }
 0xb14   : > { %v2679_v16 = vpop.permute.xlu1 %2678 }
 0xb18   : > { %v2757_v23 = vpop.permute.xlu1 %2756 }
 0xb1a   : > { %v5112_v10 = vpop.eup %5111 }
 0xb1b   : > { %v2514_v11 = vsel %vm1177_vm2, %v5112_v10, 0.0 }
 0xb1c   : > { %2515 = vadd.xlane.f32.xlu0 %v2514_v11  ;;  %v2755_v26 = vpop.permute.xlu1 %2754 }
 0xb1e   : > { %v5114_v12 = vpop.eup %5113 }
 0xb1f   : > { %v2517_v13 = vsel %vm1177_vm2, %v5114_v12, 0.0 }
 0xb20   : > { %2518 = vadd.xlane.f32.xlu0 %v2517_v13 }
 0xb36   : > { %2676 = vrot.lane.b32.xlu0 %v5916_v45, %s5520_s11 }
 0xba5   : > { %v2516_v14 = vpop.xlane.xlu0 %2515 }
 0xba6   : > { %5115 = vrcp.f32 %v2516_v14 }
 0xba9   : > { %v2519_v15 = vpop.xlane.xlu0 %2518 }
 0xbaa   : > { %5117 = vrcp.f32 %v2519_v15 }
 0xbad   : > { %v2677_v25 = vpop.permute.xlu0 %2676 }
 0xbb3   : > { %v5116_v18 = vpop.eup %5115 }
 0xbb4   : > { %v2522_v20 = vmul.f32 %v5116_v18, %v5112_v10 }
 0xbb6   : > { %4813 = vmatmul.mubr.msk.f32.vlgmr.msra.gmra.mxu1 %vm1177_vm2, %v2522_v20 }
 0xbb7   : > { %v5118_v22 = vpop.eup %5117  ;;  %4821 = vmatpush3.xpose.msk.msra.mxu1 %vm1022_vm1, %v2679_v16  ;;  %4822 = vmatprep.mubr.msk.f32.mxu1 %vm5515_vm0, %v5514_v6 }
 0xbb8   : > { %v2523_v24 = vmul.f32 %v5118_v22, %v5114_v12  ;;  %4830 = vmatprep.subr.mxu1 %v5514_v6 }
 0xbba   : > { %4818 = vmatmul.mubr.msk.f32.vlgmr.msra.gmra.mxu0 %vm1177_vm2, %v2523_v24  ;;  %4823 = vmatmul.mubr.msk.f32.vlgmr.msra.gmra.mxu1 %vm1022_vm1, %v2677_v25 }
 0xbbb   : > { %4826 = vmatpush3.xpose.msk.msra.mxu0 %vm1022_vm1, %v2757_v23  ;;  %4827 = vmatprep.mubr.msk.f32.mxu0 %vm5515_vm0, %v5514_v6 }
 0xbbc   : > { %4835 = vmatprep.subr.mxu0 %v5514_v6  ;;  %4832 = vmatprep.mubr.msk.f32.mxu1 %vm5515_vm0, %v5514_v6 }
 0xbbe   : > { %4828 = vmatmul.mubr.msk.f32.vlgmr.msra.gmra.mxu0 %vm1022_vm1, %v2755_v26 }
 0xbbf   : > { %4837 = vmatprep.mubr.msk.f32.mxu0 %vm5515_vm0, %v5514_v6 }
 0xc76   : > { %v6154_v29 = vpop.f32.mrf.mxu1 }
 0xc78   : > { %v4814_v30 = vpop.f32.mrf.mxu1 }
 0xc7a   : > { %v6156_v31 = vpop.f32.mrf.mxu0  ;;  %v2750_v32 = vpop.f32.mrf.mxu1 }
 0xc7b   : > { %v5059_v33 = vpack.i.bf16 %v6156_v31, %v6154_v29  ;;  %v2832_v34 = vmul.f32 0.25, %v2750_v32 }
 0xc7c   : > { %v4819_v35 = vpop.f32.mrf.mxu0  ;;  %v4824_v36 = vpop.f32.mrf.mxu1 }
 0xc7d   : > { %v2834_v37 = vsel %vm1177_vm2, %v2832_v34, -inf }
 0xc7e   : > { %2835 = vmax.xlane.f32.xlu0 %v2834_v37  ;;  %v2828_v40 = vpop.f32.mrf.mxu0 }
 0xc7f   : > { %v2833_v43 = vmul.f32 0.25, %v2828_v40 }
 0xc80   : > { %v4829_v48 = vpop.f32.mrf.mxu0 }
 0xc81   : > { %v2837_v52 = vsel %vm1177_vm2, %v2833_v43, -inf }
 0xc82   : > { %2838 = vmax.xlane.f32.xlu1 %v2837_v52 }
 0xc93   : > { %2932 = vrot.lane.b32.xlu1 %v5972_v27, %s5520_s11 }
 0xc94   : > { %2856 = vrot.lane.b32.xlu0 %v5974_v28, %s5520_s11 }
 0xc97   : > { %3010 = vrot.lane.b32.xlu1 %v5918_v47, %s5521_s22 }
 0xc9b   : > { %3088 = vrot.lane.b32.xlu1 %v5925_v50, %s5521_s22 }
 0xc9f   : > { %3086 = vrot.lane.b32.xlu1 %v5933_v51, %s5521_s22 }
 0xd07   : > { %v2836_v54 = vpop.xlane.xlu0 %2835 }
 0xd08   : > { %v2840_v55 = vsub.f32 %v2832_v34, %v2836_v54 }
 0xd0a   : > { %v2842_v56 = vmul.f32 1.442695, %v2840_v55 }
 0xd0b   : > { %v2857_v57 = vpop.permute.xlu0 %2856  ;;  %v2839_v58 = vpop.xlane.xlu1 %2838 }
 0xd0c   : > { %5119 = vpow2.f32 %v2842_v56  ;;  %v2841_v59 = vsub.f32 %v2833_v43, %v2839_v58  ;;  %4831 = vmatpush3.msra.mxu1 %v2857_v57 }
 0xd0d   : > { %4840 = vmatprep.subr.mxu1 %v5514_v6 }
 0xd0e   : > { %v2844_v60 = vmul.f32 1.442695, %v2841_v59 }
 0xd0f   : > { %v2933_v61 = vpop.permute.xlu1 %2932 }
 0xd10   : > { %5121 = vpow2.f32 %v2844_v60  ;;  %4836 = vmatpush3.msra.mxu0 %v2933_v61 }
 0xd11   : > { %4845 = vmatprep.subr.mxu0 %v5514_v6 }
 0xd13   : > { %v3011_v8 = vpop.permute.xlu1 %3010 }
 0xd17   : > { %v3089_v12 = vpop.permute.xlu1 %3088 }
 0xd19   : > { %v5120_v62 = vpop.eup %5119 }
 0xd1a   : > { %v2846_v0 = vsel %vm1177_vm2, %v5120_v62, 0.0 }
 0xd1b   : > { %2847 = vadd.xlane.f32.xlu0 %v2846_v0  ;;  %v3087_v15 = vpop.permute.xlu1 %3086 }
 0xd1d   : > { %v5122_v2 = vpop.eup %5121 }
 0xd1e   : > { %v2849_v4 = vsel %vm1177_vm2, %v5122_v2, 0.0 }
 0xd1f   : > { %2850 = vadd.xlane.f32.xlu0 %v2849_v4 }
 0xd35   : > { %3008 = vrot.lane.b32.xlu0 %v5916_v45, %s5521_s22 }
 0xda4   : > { %v2848_v5 = vpop.xlane.xlu0 %2847 }
 0xda5   : > { %5123 = vrcp.f32 %v2848_v5 }
 0xda8   : > { %v2851_v7 = vpop.xlane.xlu0 %2850 }
 0xda9   : > { %5125 = vrcp.f32 %v2851_v7 }
 0xdac   : > { %v3009_v14 = vpop.permute.xlu0 %3008 }
 0xdb2   : > { %v5124_v9 = vpop.eup %5123 }
 0xdb3   : > { %v2854_v10 = vmul.f32 %v5124_v9, %v5120_v62 }
 0xdb5   : > { %4833 = vmatmul.mubr.msk.f32.vlgmr.msra.gmra.mxu1 %vm1177_vm2, %v2854_v10 }
 0xdb6   : > { %v5126_v11 = vpop.eup %5125  ;;  %4841 = vmatpush3.xpose.msk.msra.mxu1 %vm1022_vm1, %v3011_v8  ;;  %4842 = vmatprep.mubr.msk.f32.mxu1 %vm5515_vm0, %v5514_v6 }
 0xdb7   : > { %v2855_v13 = vmul.f32 %v5126_v11, %v5122_v2  ;;  %4850 = vmatprep.subr.mxu1 %v5514_v6 }
 0xdb9   : > { %4838 = vmatmul.mubr.msk.f32.vlgmr.msra.gmra.mxu0 %vm1177_vm2, %v2855_v13  ;;  %4843 = vmatmul.mubr.msk.f32.vlgmr.msra.gmra.mxu1 %vm1022_vm1, %v3009_v14 }
 0xdba   : > { %4846 = vmatpush3.xpose.msk.msra.mxu0 %vm1022_vm1, %v3089_v12  ;;  %4847 = vmatprep.mubr.msk.f32.mxu0 %vm5515_vm0, %v5514_v6 }
 0xdbb   : > { %4855 = vmatprep.subr.mxu0 %v5514_v6  ;;  %4852 = vmatprep.mubr.msk.f32.mxu1 %vm5515_vm0, %v5514_v6 }
 0xdbd   : > { %4848 = vmatmul.mubr.msk.f32.vlgmr.msra.gmra.mxu0 %vm1022_vm1, %v3087_v15 }
 0xdbe   : > { %4857 = vmatprep.mubr.msk.f32.mxu0 %vm5515_vm0, %v5514_v6 }
 0xe75   : > { %v6194_v16 = vpop.f32.mrf.mxu1 }
 0xe77   : > { %v4834_v18 = vpop.f32.mrf.mxu1 }
 0xe79   : > { %v6196_v20 = vpop.f32.mrf.mxu0  ;;  %v3082_v22 = vpop.f32.mrf.mxu1 }
 0xe7a   : > { %v5064_v23 = vpack.i.bf16 %v6196_v20, %v6194_v16  ;;  %v3164_v24 = vmul.f32 0.25, %v3082_v22  ;;  %v3762_v16 = vld [vmem:[%s5818_s16 + $0x70] sm:$0xff]  ;;  %v3761_v20 = vld [vmem:[%s5818_s16 + $0x68] sm:$0xff] }
 0xe7b   : > { %v4839_v25 = vpop.f32.mrf.mxu0  ;;  %v4844_v26 = vpop.f32.mrf.mxu1 }
 0xe7c   : > { %v3166_v30 = vsel %vm1177_vm2, %v3164_v24, -inf }
 0xe7d   : > { %3167 = vmax.xlane.f32.xlu0 %v3166_v30  ;;  %v3160_v32 = vpop.f32.mrf.mxu0 }
 0xe7e   : > { %v3165_v34 = vmul.f32 0.25, %v3160_v32 }
 0xe7f   : > { %v4849_v35 = vpop.f32.mrf.mxu0 }
 0xe80   : > { %v3169_v36 = vsel %vm1177_vm2, %v3165_v34, -inf }
 0xe81   : > { %3170 = vmax.xlane.f32.xlu1 %v3169_v36  ;;  %v3759_v36 = vld [vmem:[%s5818_s16 + $0x58] sm:$0xff] }
 0xe92   : > { %3264 = vrot.lane.b32.xlu1 %v5972_v27, %s5521_s22 }
 0xe93   : > { %3188 = vrot.lane.b32.xlu0 %v5974_v28, %s5521_s22 }
 0xe96   : > { %3342 = vrot.lane.b32.xlu1 %v5918_v47, %s5522_s19 }
 0xe9a   : > { %3420 = vrot.lane.b32.xlu1 %v5925_v50, %s5522_s19 }
 0xe9e   : > { %3418 = vrot.lane.b32.xlu1 %v5933_v51, %s5522_s19 }
 0xf06   : > { %v3168_v37 = vpop.xlane.xlu0 %3167 }
 0xf07   : > { %v3172_v40 = vsub.f32 %v3164_v24, %v3168_v37  ;;  %v3758_v37 = vld [vmem:[%s5818_s16 + $0x50] sm:$0xff] }
 0xf09   : > { %v3174_v43 = vmul.f32 1.442695, %v3172_v40  ;;  %v3757_v40 = vld [vmem:[%s5818_s16 + $0x48] sm:$0xff] }
 0xf0a   : > { %v3189_v48 = vpop.permute.xlu0 %3188  ;;  %v3171_v52 = vpop.xlane.xlu1 %3170 }
 0xf0b   : > { %5127 = vpow2.f32 %v3174_v43  ;;  %v3173_v54 = vsub.f32 %v3165_v34, %v3171_v52  ;;  %4851 = vmatpush3.msra.mxu1 %v3189_v48  ;;  %v3756_v43 = vld [vmem:[%s5818_s16 + $0x40] sm:$0xff]  ;;  %v3755_v48 = vld [vmem:[%s5818_s16 + $0x38] sm:$0xff]  ;;  %v3754_v52 = vld [vmem:[%s5818_s16 + $0x30] sm:$0xff] }
 0xf0c   : > { %4860 = vmatprep.subr.mxu1 %v5514_v6 }
 0xf0d   : > { %v3176_v55 = vmul.f32 1.442695, %v3173_v54  ;;  %v3753_v54 = vld [vmem:[%s5818_s16 + $0x28] sm:$0xff] }
 0xf0e   : > { %v3265_v56 = vpop.permute.xlu1 %3264 }
 0xf0f   : > { %5129 = vpow2.f32 %v3176_v55  ;;  %4856 = vmatpush3.msra.mxu0 %v3265_v56  ;;  %v3752_v55 = vld [vmem:[%s5818_s16 + $0x20] sm:$0xff]  ;;  %v3751_v56 = vld [vmem:[%s5818_s16 + $0x18] sm:$0xff] }
 0xf10   : > { %4865 = vmatprep.subr.mxu0 %v5514_v6 }
 0xf12   : > { %v3343_v60 = vpop.permute.xlu1 %3342 }
 0xf16   : > { %v3421_v2 = vpop.permute.xlu1 %3420 }
 0xf18   : > { %v5128_v47 = vpop.eup %5127 }
 0xf19   : > { %v3178_v50 = vsel %vm1177_vm2, %v5128_v47, 0.0 }
 0xf1a   : > { %3179 = vadd.xlane.f32.xlu0 %v3178_v50  ;;  %v3419_v5 = vpop.permute.xlu1 %3418  ;;  %v3749_v50 = vld [vmem:[%s5818_s16 + $0x8] sm:$0xff] }
 0xf1c   : > { %v5130_v51 = vpop.eup %5129 }
 0xf1d   : > { %v3181_v57 = vsel %vm1177_vm2, %v5130_v51, 0.0 }
 0xf1e   : > { %3182 = vadd.xlane.f32.xlu0 %v3181_v57 }
 0xf34   : > { %3340 = vrot.lane.b32.xlu0 %v5916_v45, %s5522_s19 }
 0xfa3   : > { %v3180_v58 = vpop.xlane.xlu0 %3179 }
 0xfa4   : > { %5131 = vrcp.f32 %v3180_v58 }
 0xfa7   : > { %v3183_v59 = vpop.xlane.xlu0 %3182 }
 0xfa8   : > { %5133 = vrcp.f32 %v3183_v59 }
 0xfab   : > { %v3341_v45 = vpop.permute.xlu0 %3340 }
 0xfb1   : > { %v5132_v61 = vpop.eup %5131 }
 0xfb2   : > { %v3186_v62 = vmul.f32 %v5132_v61, %v5128_v47  ;;  %v3750_v47 = vld [vmem:[%s5818_s16 + $0x10] sm:$0xff] }
 0xfb4   : > { %4853 = vmatmul.mubr.msk.f32.vlgmr.msra.gmra.mxu1 %vm1177_vm2, %v3186_v62 }
 0xfb5   : > { %v5134_v0 = vpop.eup %5133  ;;  %4861 = vmatpush3.xpose.msk.msra.mxu1 %vm1022_vm1, %v3343_v60  ;;  %4862 = vmatprep.mubr.msk.f32.mxu1 %vm5515_vm0, %v5514_v6 }
 0xfb6   : > { %v3187_v4 = vmul.f32 %v5134_v0, %v5130_v51  ;;  %4870 = vmatprep.subr.mxu1 %v5514_v6  ;;  %v3748_v51 = vld [vmem:[%s5818_s16] sm:$0xff] }
 0xfb8   : > { %4858 = vmatmul.mubr.msk.f32.vlgmr.msra.gmra.mxu0 %vm1177_vm2, %v3187_v4  ;;  %4863 = vmatmul.mubr.msk.f32.vlgmr.msra.gmra.mxu1 %vm1022_vm1, %v3341_v45 }
 0xfb9   : > { %4866 = vmatpush3.xpose.msk.msra.mxu0 %vm1022_vm1, %v3421_v2  ;;  %4867 = vmatprep.mubr.msk.f32.mxu0 %vm5515_vm0, %v5514_v6 }
 0xfba   : > { %4875 = vmatprep.subr.mxu0 %v5514_v6  ;;  %4872 = vmatprep.mubr.msk.f32.mxu1 %vm5515_vm0, %v5514_v6 }
 0xfbc   : > { %4868 = vmatmul.mubr.msk.f32.vlgmr.msra.gmra.mxu0 %vm1022_vm1, %v3419_v5 }
 0xfbd   : > { %4877 = vmatprep.mubr.msk.f32.mxu0 %vm5515_vm0, %v5514_v6 }
0x1074   : > { %v3260_v7 = vpop.f32.mrf.mxu1 }
0x1076   : > { %v4854_v8 = vpop.f32.mrf.mxu1 }
0x1078   : > { %v3336_v9 = vpop.f32.mrf.mxu0  ;;  %v3414_v10 = vpop.f32.mrf.mxu1 }
0x1079   : > { %v3496_v11 = vmul.f32 0.25, %v3414_v10  ;;  %v5069_v25 = vpack.i.bf16 %v3336_v9, %v3260_v7 }
0x107a   : > { %v4859_v12 = vpop.f32.mrf.mxu0  ;;  %v4864_v13 = vpop.f32.mrf.mxu1 }
0x107b   : > { %v3498_v14 = vsel %vm1177_vm2, %v3496_v11, -inf }
0x107c   : > { %3499 = vmax.xlane.f32.xlu0 %v3498_v14  ;;  %v3492_v15 = vpop.f32.mrf.mxu0 }
0x107d   : > { %v3497_v18 = vmul.f32 0.25, %v3492_v15 }
0x107e   : > { %v4869_v22 = vpop.f32.mrf.mxu0 }
0x107f   : > { %v3501_v24 = vsel %vm1177_vm2, %v3497_v18, -inf }
0x1080   : > { %3502 = vmax.xlane.f32.xlu1 %v3501_v24 }
0x1091   : > { %3596 = vrot.lane.b32.xlu1 %v5972_v27, %s5522_s19 }
0x1095   : > { %5045 = vrot.lane.b32.xlu1 %v5044_v21, %s5522_s19 }
0x1099   : > { %5050 = vrot.lane.b32.xlu1 %v5049_v3, %s5521_s22 }
0x109d   : > { %5060 = vrot.lane.b32.xlu1 %v5059_v33, %s5519_s4 }
0x10a1   : > { %5070 = vrot.lane.b32.xlu1 %v5069_v25, %s5517_s2 }
0x1105   : > { %v3500_v26 = vpop.xlane.xlu0 %3499 }
0x1106   : > { %v3504_v27 = vsub.f32 %v3496_v11, %v3500_v26 }
0x1108   : > { %v3506_v30 = vmul.f32 1.442695, %v3504_v27 }
0x1109   : > { %v3503_v32 = vpop.xlane.xlu1 %3502 }
0x110a   : > { %5135 = vpow2.f32 %v3506_v30  ;;  %v3505_v17 = vsub.f32 %v3497_v18, %v3503_v32 }
0x110c   : > { %v3508_v19 = vmul.f32 1.442695, %v3505_v17 }
0x110d   : > { %v3597_v21 = vpop.permute.xlu1 %3596 }
0x110e   : > { %5137 = vpow2.f32 %v3508_v19  ;;  %4876 = vmatpush3.msra.mxu0 %v3597_v21 }
0x1111   : > { %v5046_v62 = vpop.permute.xlu1 %5045 }
0x1112   : > { %v5048_v4 = vunpack.i.h.bf16 %v5046_v62  ;;  %v5047_v45 = vunpack.i.l.bf16 %v5046_v62  ;;  %v3912_v62 = vld [vmem:[%s5831_s1 + $0xb8] sm:$0xff] }
0x1114   : > { %v3729_v12 = vsel %vm1022_vm1, %v5998_v44, %v5048_v4  ;;  %v3728_v13 = vsel %vm1022_vm1, %v5996_v42, %v5047_v45  ;;  %v3909_v4 = vld [vmem:[%s5831_s1 + $0xa0] sm:$0xff]  ;;  %v3908_v45 = vld [vmem:[%s5831_s1 + $0x98] sm:$0xff] }
0x1115   : > { %v5051_v0 = vpop.permute.xlu1 %5050 }
0x1116   : > { %v5053_v5 = vunpack.i.h.bf16 %v5051_v0  ;;  %v5052_v7 = vunpack.i.l.bf16 %v5051_v0  ;;  %v3911_v0 = vld [vmem:[%s5831_s1 + $0xb0] sm:$0xff] }
0x1117   : > { %v5136_v63 = vpop.eup %5135 }
0x1118   : > { %v3510_v1 = vsel %vm1177_vm2, %v5136_v63, 0.0  ;;  %v3731_v14 = vsel %vm3730_vm3, %v3728_v13, %v5052_v7  ;;  %v3732_v15 = vsel %vm3730_vm3, %v3729_v12, %v5053_v5  ;;  %v3907_v5 = vld [vmem:[%s5831_s1 + $0x90] sm:$0xff]  ;;  %v3906_v7 = vld [vmem:[%s5831_s1 + $0x88] sm:$0xff]  ;;  %v3901_v12 = vld [vmem:[%s5831_s1 + $0x60] sm:$0xff] }
0x1119   : > { %3511 = vadd.xlane.f32.xlu0 %v3510_v1  ;;  %v5061_v8 = vpop.permute.xlu1 %5060  ;;  %v3900_v13 = vld [vmem:[%s5831_s1 + $0x58] sm:$0xff] }
0x111a   : > { %v5063_v26 = vunpack.i.h.bf16 %v5061_v8  ;;  %v5062_v27 = vunpack.i.l.bf16 %v5061_v8  ;;  %v3905_v8 = vld [vmem:[%s5831_s1 + $0x80] sm:$0xff] }
0x111b   : > { %v5138_v3 = vpop.eup %5137 }
0x111c   : > { %v3513_v29 = vsel %vm1177_vm2, %v5138_v3, 0.0 }
0x111d   : > { %3514 = vadd.xlane.f32.xlu0 %v3513_v29  ;;  %v5071_v30 = vpop.permute.xlu1 %5070 }
0x111e   : > { %v5073_v44 = vunpack.i.h.bf16 %v5071_v30 }
0x1133   : > { %3520 = vrot.lane.b32.xlu0 %v5974_v28, %s5522_s19 }
0x1137   : > { %5055 = vrot.lane.b32.xlu0 %v5054_v53, %s5520_s11  ;;  %v3763_v53 = vld [vmem:[%s5818_s16 + $0x78] sm:$0xff] }
0x113b   : > { %5065 = vrot.lane.b32.xlu0 %v5064_v23, %s5518_s17  ;;  %v3760_v23 = vld [vmem:[%s5818_s16 + $0x60] sm:$0xff] }
0x11a2   : > { %v3512_v31 = vpop.xlane.xlu0 %3511 }
0x11a3   : > { %5139 = vrcp.f32 %v3512_v31 }
0x11a6   : > { %v3515_v33 = vpop.xlane.xlu0 %3514 }
0x11a7   : > { %5141 = vrcp.f32 %v3515_v33 }
0x11aa   : > { %v3521_v34 = vpop.permute.xlu0 %3520 }
0x11ab   : > { %4871 = vmatpush3.msra.mxu1 %v3521_v34 }
0x11ac   : > { %4880 = vmatprep.subr.mxu1 %v3763_v53 }
0x11ae   : > { %v5056_v2 = vpop.permute.xlu0 %5055 }
0x11af   : > { %v5058_v9 = vunpack.i.h.bf16 %v5056_v2  ;;  %v5057_v10 = vunpack.i.l.bf16 %v5056_v2  ;;  %v3910_v2 = vld [vmem:[%s5831_s1 + $0xa8] sm:$0xff] }
0x11b0   : > { %v5140_v28 = vpop.eup %5139 }
0x11b1   : > { %v3518_v35 = vmul.f32 %v5140_v28, %v5136_v63  ;;  %v3734_v18 = vsel %vm3733_vm4, %v3731_v14, %v5057_v10  ;;  %v3735_v22 = vsel %vm3733_vm4, %v3732_v15, %v5058_v9  ;;  %v5072_v63 = vunpack.i.l.bf16 %v5071_v30  ;;  %v4533_v28 = vld [vmem:[%s784_s10] ss:$0 sm:$0xff]  ;;  %v3904_v9 = vld [vmem:[%s5831_s1 + $0x78] sm:$0xff]  ;;  %v3898_v15 = vld [vmem:[%s5831_s1 + $0x48] sm:$0xff]  ;;  %s6490_s10 = scalar_lea.vmem [#allocation12], %s5805_s18 }
0x11b2   : > { %v5066_v11 = vpop.permute.xlu0 %5065  ;;  %v3738_v32 = vsel %vm3736_vm5, %v3735_v22, %v5063_v26  ;;  %v3737_v17 = vsel %vm3736_vm5, %v3734_v18, %v5062_v27  ;;  %v3903_v10 = vld [vmem:[%s5831_s1 + $0x70] sm:$0xff]  ;;  %v3897_v18 = vld [vmem:[%s5831_s1 + $0x40] sm:$0xff]  ;;  %v3896_v22 = vld [vmem:[%s5831_s1 + $0x38] sm:$0xff] }
0x11b3   : > { %4873 = vmatmul.mubr.msk.f32.vlgmr.msra.gmra.mxu1 %vm1177_vm2, %v3518_v35  ;;  %v5068_v24 = vunpack.i.h.bf16 %v5066_v11  ;;  %v5067_v25 = vunpack.i.l.bf16 %v5066_v11  ;;  %v3902_v11 = vld [vmem:[%s5831_s1 + $0x68] sm:$0xff]  ;;  %v3899_v14 = vld [vmem:[%s5831_s1 + $0x50] sm:$0xff]  ;;  %v3893_v26 = vld [vmem:[%s5831_s1 + $0x20] sm:$0xff] }
0x11b4   : > { %v5142_v46 = vpop.eup %5141  ;;  %4881 = vmatpush3.msra.mxu1 %v3763_v53  ;;  %v3892_v27 = vld [vmem:[%s5831_s1 + $0x18] sm:$0xff]  ;;  %v3891_v30 = vld [vmem:[%s5831_s1 + $0x10] sm:$0xff] }
0x11b5   : > { %v3519_v49 = vmul.f32 %v5142_v46, %v5138_v3  ;;  %4882 = vmatprep.subr.mxu1 %v3762_v16  ;;  %v3741_v19 = vsel %vm3739_vm6, %v3738_v32, %v5068_v24  ;;  %v3740_v21 = vsel %vm3739_vm6, %v3737_v17, %v5067_v25  ;;  %v3895_v24 = vld [vmem:[%s5831_s1 + $0x30] sm:$0xff]  ;;  %v3894_v25 = vld [vmem:[%s5831_s1 + $0x28] sm:$0xff]  ;;  %v3889_v17 = vld [vmem:[%s5831_s1] sm:$0xff] }
0x11b6   : > { %4883 = vmatpush3.msra.mxu1 %v3762_v16  ;;  %v3743_v29 = vsel %vm3742_vm7, %v3740_v21, %v5072_v63  ;;  %v3744_v31 = vsel %vm3742_vm7, %v3741_v19, %v5073_v44  ;;  %v5151_v16 = vld [vmem:[#allocation2 + $0x8] sm:$0xff]  ;;  %v3890_v32 = vld [vmem:[%s5831_s1 + $0x8] sm:$0xff]  ;;  %v4044_v44 = vld [vmem:[%s5833_s28 + $0xf0] sm:$0xff] }
0x11b7   : > { %4878 = vmatmul.mubr.msk.f32.vlgmr.msra.gmra.mxu0 %vm1177_vm2, %v3519_v49  ;;  %4884 = vmatprep.subr.mxu1 %v3761_v20  ;;  %v4045_v19 = vld [vmem:[%s5833_s28 + $0xf8] sm:$0xff]  ;;  %v4028_v63 = vld [vmem:[%s5833_s28 + $0x70] sm:$0xff] }
0x11b8   : > { %3997 = vmatprep.mubr.f32.mxu0 %v5514_v6  ;;  %4885 = vmatpush3.msra.mxu1 %v3761_v20  ;;  %v4029_v21 = vld [vmem:[%s5833_s28 + $0x78] sm:$0xff] }
0x11b9   : > { %4886 = vmatprep.subr.mxu1 %v3760_v23 }
0x11ba   : > { %4887 = vmatpush3.msra.mxu1 %v3760_v23  ;;  %v5152_v23 = vld [vmem:[#allocation2] sm:$0xff] }
0x11bb   : > { %4888 = vmatprep.subr.mxu1 %v3759_v36 }
0x11bc   : > { %4889 = vmatpush3.msra.mxu1 %v3759_v36 }
0x11bd   : > { %4890 = vmatprep.subr.mxu1 %v3758_v37 }
0x11be   : > { %4891 = vmatpush3.msra.mxu1 %v3758_v37  ;;  %v3920_v37 = vld [vmem:[%s5831_s1 + $0xf8] sm:$0xff] }
0x11bf   : > { %4892 = vmatprep.subr.mxu1 %v3757_v40  ;;  %3933 = vmatprep.subr.mxu0 %v3920_v37  ;;  %v4035_v37 = vld [vmem:[%s5833_s28 + $0xa8] sm:$0xff] }
0x11c0   : > { %4893 = vmatpush3.msra.mxu1 %v3757_v40  ;;  %v3919_v40 = vld [vmem:[%s5831_s1 + $0xf0] sm:$0xff] }
0x11c1   : > { %4894 = vmatprep.subr.mxu1 %v3756_v43  ;;  %3934 = vmatpush1.msra.mxu0 %v3919_v40  ;;  %v4019_v40 = vld [vmem:[%s5833_s28 + $0x28] sm:$0xff] }
0x11c2   : > { %4895 = vmatpush3.msra.mxu1 %v3756_v43  ;;  %v3918_v43 = vld [vmem:[%s5831_s1 + $0xe8] sm:$0xff] }
0x11c3   : > { %4896 = vmatprep.subr.mxu1 %v3755_v48  ;;  %3935 = vmatprep.subr.mxu0 %v3918_v43  ;;  %v4034_v43 = vld [vmem:[%s5833_s28 + $0xa0] sm:$0xff] }
0x11c4   : > { %4897 = vmatpush3.msra.mxu1 %v3755_v48  ;;  %v3917_v48 = vld [vmem:[%s5831_s1 + $0xe0] sm:$0xff] }
0x11c5   : > { %4898 = vmatprep.subr.mxu1 %v3754_v52  ;;  %3936 = vmatpush1.msra.mxu0 %v3917_v48  ;;  %v4018_v48 = vld [vmem:[%s5833_s28 + $0x20] sm:$0xff] }
0x11c6   : > { %4899 = vmatpush3.msra.mxu1 %v3754_v52  ;;  %v3916_v52 = vld [vmem:[%s5831_s1 + $0xd8] sm:$0xff] }
0x11c7   : > { %4900 = vmatprep.subr.mxu1 %v3753_v54  ;;  %3937 = vmatprep.subr.mxu0 %v3916_v52 }
0x11c8   : > { %4901 = vmatpush3.msra.mxu1 %v3753_v54  ;;  %v3915_v54 = vld [vmem:[%s5831_s1 + $0xd0] sm:$0xff] }
0x11c9   : > { %4902 = vmatprep.subr.mxu1 %v3752_v55  ;;  %3938 = vmatpush1.msra.mxu0 %v3915_v54 }
0x11ca   : > { %4903 = vmatpush3.msra.mxu1 %v3752_v55  ;;  %v3914_v55 = vld [vmem:[%s5831_s1 + $0xc8] sm:$0xff] }
0x11cb   : > { %4904 = vmatprep.subr.mxu1 %v3751_v56  ;;  %3939 = vmatprep.subr.mxu0 %v3914_v55 }
0x11cc   : > { %4905 = vmatpush3.msra.mxu1 %v3751_v56  ;;  %v3913_v56 = vld [vmem:[%s5831_s1 + $0xc0] sm:$0xff]  ;;  %s6489_s1 = scalar_lea.vmem [#allocation11], %s5805_s18 }
0x11cd   : > { %4906 = vmatprep.subr.mxu1 %v3750_v47  ;;  %3940 = vmatpush1.msra.mxu0 %v3913_v56 }
0x11ce   : > { %4907 = vmatpush3.msra.mxu1 %v3750_v47  ;;  %3941 = vmatprep.subr.mxu0 %v3912_v62 }
0x11cf   : > { %4908 = vmatprep.subr.mxu1 %v3749_v50  ;;  %3942 = vmatpush1.msra.mxu0 %v3911_v0 }
0x11d0   : > { %4909 = vmatpush3.msra.mxu1 %v3749_v50  ;;  %3943 = vmatprep.subr.mxu0 %v3910_v2 }
0x11d1   : > { %4910 = vmatprep.subr.mxu1 %v3748_v51  ;;  %3944 = vmatpush1.msra.mxu0 %v3909_v4 }
0x11d2   : > { %4911 = vmatpush3.msra.mxu1 %v3748_v51  ;;  %3945 = vmatprep.subr.mxu0 %v3908_v45 }
0x11d3   : > { %3946 = vmatpush1.msra.mxu0 %v3907_v5  ;;  %4647 = vmatprep.subr.mxu1 %v4045_v19 }
0x11d4   : > { %3947 = vmatprep.subr.mxu0 %v3906_v7  ;;  %v4033_v7 = vld [vmem:[%s5833_s28 + $0x98] sm:$0xff] }
0x11d5   : > { %3948 = vmatpush1.msra.mxu0 %v3905_v8  ;;  %v4032_v8 = vld [vmem:[%s5833_s28 + $0x90] sm:$0xff] }
0x11d6   : > { %3949 = vmatprep.subr.mxu0 %v3904_v9  ;;  %v4016_v9 = vld [vmem:[%s5833_s28 + $0x10] sm:$0xff] }
0x11d7   : > { %3950 = vmatpush1.msra.mxu0 %v3903_v10  ;;  %v4031_v10 = vld [vmem:[%s5833_s28 + $0x88] sm:$0xff] }
0x11d8   : > { %3951 = vmatprep.subr.mxu0 %v3902_v11  ;;  %v4030_v11 = vld [vmem:[%s5833_s28 + $0x80] sm:$0xff] }
0x11d9   : > { %3952 = vmatpush1.msra.mxu0 %v3901_v12  ;;  %v4014_v12 = vld [vmem:[%s5833_s28] sm:$0xff] }
0x11da   : > { %3953 = vmatprep.subr.mxu0 %v3900_v13 }
0x11db   : > { %3954 = vmatpush1.msra.mxu0 %v3899_v14 }
0x11dc   : > { %3955 = vmatprep.subr.mxu0 %v3898_v15 }
0x11dd   : > { %3956 = vmatpush1.msra.mxu0 %v3897_v18 }
0x11de   : > { %3957 = vmatprep.subr.mxu0 %v3896_v22 }
0x11df   : > { %3958 = vmatpush1.msra.mxu0 %v3895_v24 }
0x11e0   : > { %3959 = vmatprep.subr.mxu0 %v3894_v25 }
0x11e1   : > { %3960 = vmatpush1.msra.mxu0 %v3893_v26 }
0x11e2   : > { %3961 = vmatprep.subr.mxu0 %v3892_v27 }
0x11e3   : > { %3962 = vmatpush1.msra.mxu0 %v3891_v30 }
0x11e4   : > { %3963 = vmatprep.subr.mxu0 %v3890_v32 }
0x11e5   : > { %3964 = vmatpush1.msra.mxu0 %v3889_v17 }
0x1273   : > { %v3592_v57 = vpop.f32.mrf.mxu1 }
0x1275   : > { %v4874_v58 = vpop.f32.mrf.mxu1 }
0x1277   : > { %v3668_v59 = vpop.f32.mrf.mxu0 }
0x1278   : > { %v5074_v60 = vpack.i.bf16 %v3668_v59, %v3592_v57 }
0x1279   : > { %v4879_v61 = vpop.f32.mrf.mxu0 }
0x127a   : > { %5075 = vrot.lane.b32.xlu0 %v5074_v60, %s5516_s0 }
0x12ec   : > { %v5076_v42 = vpop.permute.xlu0 %5075 }
0x12ed   : > { %v5078_v1 = vunpack.i.h.bf16 %v5076_v42  ;;  %v5077_v3 = vunpack.i.l.bf16 %v5076_v42  ;;  %v4043_v42 = vld [vmem:[%s5833_s28 + $0xe8] sm:$0xff] }
0x12ef   : > { %v3746_v33 = vsel %vm3745_vm8, %v3743_v29, %v5077_v3  ;;  %v3747_v34 = vsel %vm3745_vm8, %v3744_v31, %v5078_v1  ;;  %v4027_v1 = vld [vmem:[%s5833_s28 + $0x68] sm:$0xff]  ;;  %v4042_v3 = vld [vmem:[%s5833_s28 + $0xe0] sm:$0xff]  ;;  %v4041_v31 = vld [vmem:[%s5833_s28 + $0xd8] sm:$0xff] }
0x12f0   : > { %4912 = vmatprep.mubr.f32.mxu1 %v3746_v33  ;;  %v4026_v29 = vld [vmem:[%s5833_s28 + $0x60] sm:$0xff]  ;;  %v4025_v33 = vld [vmem:[%s5833_s28 + $0x58] sm:$0xff] }
0x12f1   : > { %4913 = vmatmul.mubr.f32.vlgmr.msra.gmra.mxu1 %v3747_v34  ;;  %v4040_v34 = vld [vmem:[%s5833_s28 + $0xd0] sm:$0xff] }
0x12f2   : > { %4648 = vmatpush3.msra.mxu1 %v4029_v21 }
0x12f3   : > { %4649 = vmatprep.subr.mxu1 %v4044_v44 }
0x12f4   : > { %4650 = vmatpush3.msra.mxu1 %v4028_v63 }
0x12f5   : > { %4651 = vmatprep.subr.mxu1 %v4043_v42 }
0x12f6   : > { %4652 = vmatpush3.msra.mxu1 %v4027_v1 }
0x12f7   : > { %4653 = vmatprep.subr.mxu1 %v4042_v3 }
0x12f8   : > { %4654 = vmatpush3.msra.mxu1 %v4026_v29 }
0x12f9   : > { %4655 = vmatprep.subr.mxu1 %v4041_v31 }
0x12fa   : > { %4656 = vmatpush3.msra.mxu1 %v4025_v33 }
0x12fb   : > { %4657 = vmatprep.subr.mxu1 %v4040_v34 }
0x13b1   : > { %v4914_v35 = vpop.f32.mrf.mxu1 }
0x13b2   : > { %v3843_v46 = vadd.f32 %v4914_v35, %v4533_v28  ;;  %v4039_v35 = vld [vmem:[%s5833_s28 + $0xc8] sm:$0xff] }
0x13b3   : > { %v3837_v49 = vpop.f32.mrf.mxu1 }
0x13b4   : > { %v3838_v53 = vadd.f32 %v4533_v28, %v3837_v49  ;;  %v3847_v20 = vadd.f32 %v5151_v16, %v3843_v46  ;;  %v4024_v28 = vld [vmem:[%s5833_s28 + $0x50] sm:$0xff]  ;;  %v4023_v46 = vld [vmem:[%s5833_s28 + $0x48] sm:$0xff]  ;;  %v4038_v49 = vld [vmem:[%s5833_s28 + $0xc0] sm:$0xff] }
0x13b5   : > { %4658 = vmatpush3.msra.mxu1 %v4024_v28  ;;  %v4037_v16 = vld [vmem:[%s5833_s28 + $0xb8] sm:$0xff] }
0x13b6   : > { %3850 = vadd.xlane.f32.xlu0 %v3847_v20  ;;  %v3846_v36 = vadd.f32 %v5152_v23, %v3838_v53  ;;  %4659 = vmatprep.subr.mxu1 %v4039_v35  ;;  %v4022_v53 = vld [vmem:[%s5833_s28 + $0x40] sm:$0xff]  ;;  %v4036_v23 = vld [vmem:[%s5833_s28 + $0xb0] sm:$0xff] }
0x13b7   : > { %4660 = vmatpush3.msra.mxu1 %v4023_v46 }
0x13b8   : > { %3848 = vadd.xlane.f32.xlu1 %v3846_v36  ;;  %4661 = vmatprep.subr.mxu1 %v4038_v49 }
0x13b9   : > { %4662 = vmatpush3.msra.mxu1 %v4022_v53 }
0x13ba   : > { %4663 = vmatprep.subr.mxu1 %v4037_v16 }
0x143f   : > { %v3851_v47 = vpop.xlane.xlu0 %3850 }
0x1440   : > { %v3854_v51 = vmul.f32 0.0078125, %v3851_v47 }
0x1441   : > { %v3849_v50 = vpop.xlane.xlu1 %3848 }
0x1442   : > { %v3853_v57 = vmul.f32 0.0078125, %v3849_v50  ;;  %v6302_v59 = vsub.f32 %v3847_v20, %v3854_v51  ;;  %v4021_v20 = vld [vmem:[%s5833_s28 + $0x38] sm:$0xff] }
0x1443   : > { %4664 = vmatpush3.msra.mxu1 %v4021_v20 }
0x1444   : > { %v6300_v58 = vsub.f32 %v3846_v36, %v3853_v57  ;;  %v3858_v61 = vmul.f32 %v6302_v59, %v6302_v59  ;;  %v4020_v36 = vld [vmem:[%s5833_s28 + $0x30] sm:$0xff]  ;;  %4665 = vmatprep.subr.mxu1 %v4036_v23 }
0x1445   : > { %4666 = vmatpush3.msra.mxu1 %v4020_v36  ;;  %v4534_v57 = vld [vmem:[%s6489_s1] ss:$0 sm:$0xff] }
0x1446   : > { %v3857_v60 = vmul.f32 %v6300_v58, %v6300_v58  ;;  %4667 = vmatprep.subr.mxu1 %v4035_v37 }
0x1447   : > { %4668 = vmatpush3.msra.mxu1 %v4019_v40 }
0x1448   : > { %3859 = vadd.xlane.f32.xlu0 %v3857_v60  ;;  %4669 = vmatprep.subr.mxu1 %v4034_v43 }
0x1449   : > { %4670 = vmatpush3.msra.mxu1 %v4018_v48 }
0x144a   : > { %4671 = vmatprep.subr.mxu1 %v4033_v7 }
0x144c   : > { %3861 = vadd.xlane.f32.xlu0 %v3858_v61  ;;  %v4535_v61 = vld [vmem:[%s6490_s10] ss:$0 sm:$0xff] }
0x14d1   : > { %v3860_v52 = vpop.xlane.xlu0 %3859 }
0x14d2   : > { %v3863_v54 = vmul.f32 0.0078125, %v3860_v52 }
0x14d4   : > { %v3865_v55 = vadd.f32 1e-05, %v3863_v54  ;;  %v4537_v54 = vld [vmem:[%s794_s6] ss:$0 sm:$0xff] }
0x14d5   : > { %v3862_v56 = vpop.xlane.xlu0 %3861 }
0x14d6   : > { %5143 = vrsqrt.f32 %v3865_v55  ;;  %v3864_v47 = vmul.f32 0.0078125, %v3862_v56  ;;  %v4538_v56 = vld [vmem:[%s698_s7] ss:$0 sm:$0xff] }
0x14d8   : > { %v3866_v50 = vadd.f32 1e-05, %v3864_v47 }
0x14da   : > { %5145 = vrsqrt.f32 %v3866_v50 }
0x14e3   : > { %v5144_v51 = vpop.eup %5143 }
0x14e4   : > { %v3869_v60 = vmul.f32 %v5144_v51, %v6300_v58  ;;  %v4017_v58 = vld [vmem:[%s5833_s28 + $0x18] sm:$0xff] }
0x14e5   : > { %4672 = vmatpush3.msra.mxu1 %v4017_v58 }
0x14e6   : > { %v3878_v62 = vmul.f32 %v4534_v57, %v3869_v60  ;;  %4673 = vmatprep.subr.mxu1 %v4032_v8 }
0x14e7   : > { %v5146_v0 = vpop.eup %5145  ;;  %4674 = vmatpush3.msra.mxu1 %v4016_v9 }
0x14e8   : > { %v3887_v2 = vadd.f32 %v4535_v61, %v3878_v62  ;;  %v3870_v4 = vmul.f32 %v5146_v0, %v6302_v59  ;;  %4675 = vmatprep.subr.mxu1 %v4031_v10  ;;  %v4015_v59 = vld [vmem:[%s5833_s28 + $0x8] sm:$0xff] }
0x14e9   : > { %4676 = vmatpush3.msra.mxu1 %v4015_v59 }
0x14ea   : > { %3998 = vmatmul.mubr.f32.vlgmr.msra.gmra.mxu0 %v3887_v2  ;;  %v3879_v45 = vmul.f32 %v4534_v57, %v3870_v4  ;;  %4677 = vmatprep.subr.mxu1 %v4030_v11 }
0x14eb   : > { %4003 = vmatprep.mubr.f32.mxu0 %v5514_v6  ;;  %4678 = vmatpush3.msra.mxu1 %v4014_v12  ;;  %v3921_v6 = vld [vmem:[%s5851_s3] sm:$0x3]  ;;  %s6493_s3 = sld [smem:[#allocation26_spill]] }
0x14ec   : > { %v3888_v5 = vadd.f32 %v4535_v61, %v3879_v45  ;;  %v3926_v13 = vrot.slane %v3921_v6, %v857_v39  ;;  %v3930_v14 = vrot.slane %v3921_v6, %v861_v41 }
0x14ee   : > { %4004 = vmatmul.mubr.f32.gmra.mxu0 %v3888_v5 }
0x14f1   : > { %p4539_p3 = scmp.ne.s32.totalorder %s6493_s3, 3 }
0x15aa   : > { %v3999_v15 = vpop.f32.mrf.mxu0 }
0x15ab   : > { %v4000_v18 = vadd.f32 %v3999_v15, %v3926_v13 }
0x15ac   : > { %v4001_v22 = vpop.f32.mrf.mxu0 }
0x15ad   : > { %v4002_v24 = vadd.f32 %v4001_v22, %v3930_v14  ;;  %v4010_v27 = vmax.f32 %v4000_v18, 0.0 }
0x15ae   : > { %v4005_v25 = vpop.f32.mrf.mxu0 }
0x15af   : > { %v4011_v26 = vmax.f32 %v4002_v24, 0.0  ;;  %v4006_v30 = vadd.f32 %v4005_v25, %v3926_v13 }
0x15b0   : > { %v4007_v32 = vpop.f32.mrf.mxu0 }
0x15b1   : > { %v4008_v17 = vadd.f32 %v4007_v32, %v3930_v14  ;;  %4117 = vmatprep.mubr.f32.mxu1 %v4011_v26  ;;  %v4012_v21 = vmax.f32 %v4006_v30, 0.0 }
0x15b2   : > { %4118 = vmatmul.mubr.f32.vlgmr.msra.gmra.mxu1 %v4010_v27 }
0x15b3   : > { %v4013_v19 = vmax.f32 %v4008_v17, 0.0 }
0x15b5   : > { %4122 = vmatprep.mubr.f32.mxu1 %v4013_v19 }
0x15b6   : > { %4123 = vmatmul.mubr.f32.gmra.mxu1 %v4012_v21 }
0x1672   : > { %v4679_v39 = vpop.f32.mrf.mxu1 }
0x1674   : > { %v4680_v41 = vpop.f32.mrf.mxu1 }
0x1675   : > { %v4681_v44 = vadd.f32 %v4680_v41, %v4679_v39 }
0x1676   : > { %v4682_v63 = vpop.f32.mrf.mxu1 }
0x1677   : > { %v4120_v42 = vadd.f32 %v4681_v44, %v4536_v38 }
0x1678   : > { %v4683_v1 = vpop.f32.mrf.mxu1 }
0x1679   : > { %v4684_v3 = vadd.f32 %v4683_v1, %v4682_v63  ;;  %v4128_v29 = vadd.f32 %v4120_v42, %v3887_v2 }
0x167b   : > { %v4125_v31 = vadd.f32 %v4684_v3, %v4536_v38  ;;  %4130 = vadd.xlane.f32.xlu1 %v4128_v29 }
0x167d   : > { %v4129_v33 = vadd.f32 %v4125_v31, %v3888_v5 }
0x167f   : > { %4132 = vadd.xlane.f32.xlu0 %v4129_v33 }
0x1704   : > { %v4131_v34 = vpop.xlane.xlu1 %4130 }
0x1705   : > { %v4134_v28 = vmul.f32 0.0078125, %v4131_v34 }
0x1707   : > { %v4136_v35 = vsub.f32 %v4128_v29, %v4134_v28 }
0x1708   : > { %v4133_v46 = vpop.xlane.xlu0 %4132 }
0x1709   : > { %v4135_v49 = vmul.f32 0.0078125, %v4133_v46  ;;  %v4138_v53 = vmul.f32 %v4136_v35, %v4136_v35 }
0x170b   : > { %v4137_v16 = vsub.f32 %v4129_v33, %v4135_v49  ;;  %4140 = vadd.xlane.f32.xlu1 %v4138_v53 }
0x170d   : > { %v4139_v20 = vmul.f32 %v4137_v16, %v4137_v16 }
0x170f   : > { %4142 = vadd.xlane.f32.xlu0 %v4139_v20 }
0x1794   : > { %v4141_v23 = vpop.xlane.xlu1 %4140 }
0x1795   : > { %v4144_v36 = vmul.f32 0.0078125, %v4141_v23 }
0x1797   : > { %v4146_v37 = vadd.f32 1e-05, %v4144_v36 }
0x1798   : > { %v4143_v40 = vpop.xlane.xlu0 %4142 }
0x1799   : > { %5147 = vrsqrt.f32 %v4146_v37  ;;  %v4145_v43 = vmul.f32 0.0078125, %v4143_v40 }
0x179b   : > { %v4147_v48 = vadd.f32 1e-05, %v4145_v43 }
0x179d   : > { %5149 = vrsqrt.f32 %v4147_v48 }
0x17a6   : > { %v5148_v52 = vpop.eup %5147 }
0x17a7   : > { %v4150_v55 = vmul.f32 %v5148_v52, %v4136_v35 }
0x17a9   : > { %v4159_v47 = vmul.f32 %v4537_v54, %v4150_v55 }
0x17aa   : > { %v5150_v50 = vpop.eup %5149 }
0x17ab   : > { %v4168_v51 = vadd.f32 %v4538_v56, %v4159_v47  ;;  %v4151_v57 = vmul.f32 %v5150_v50, %v4137_v16 }
0x17ad   : > { %4170 = vst [vmem:[#allocation2] sm:$0xff] %v4168_v51  ;;  %v4160_v60 = vmul.f32 %v4537_v54, %v4151_v57  ;;  %4175 = sbr.rel (%p4539_p3) target bundleno = 6082 (0x17c2), region = 116 }
0x17af   : > { %v4169_v61 = vadd.f32 %v4538_v56, %v4160_v60 }
0x17b1   : > { %4171 = vst [vmem:[#allocation2 + $0x8] sm:$0xff] %v4169_v61 }
0x17b2   : > { %v4176_v62 = vrot.slane %v4168_v51, 4  ;;  %v4182_v0 = vrot.slane %v4169_v61, 4  ;;  %vm4193_vm9 = vcmask 1041409  }
0x17b4   : > { %v4177_v2 = vadd.f32 %v4176_v62, %v4168_v51  ;;  %v4183_v4 = vadd.f32 %v4182_v0, %v4169_v61 }
0x17b6   : > { %v4178_v45 = vrot.slane %v4177_v2, 2  ;;  %v4184_v5 = vrot.slane %v4183_v4, 2 }
0x17b8   : > { %v4179_v7 = vadd.f32 %v4178_v45, %v4177_v2  ;;  %v4185_v58 = vadd.f32 %v4184_v5, %v4183_v4 }
0x17ba   : > { %v4180_v8 = vrot.slane %v4179_v7, 1  ;;  %v4186_v9 = vrot.slane %v4185_v58, 1 }
0x17bc   : > { %v4181_v10 = vadd.f32 %v4180_v8, %v4179_v7  ;;  %v4187_v59 = vadd.f32 %v4186_v9, %v4185_v58 }
0x17be   : > { %v4189_v11 = vmul.f32 0.125, %v4181_v10  ;;  %v4190_v12 = vmul.f32 0.125, %v4187_v59 }
0x17c0   : > { %v4194_v6 = vsel %vm4193_vm9, %v4190_v12, %v4189_v11 }
0x17c1   : > { %4196 = vst [vmem:[#allocation18] sm:$0x3] %v4194_v6 }
0x17c2 PF: > { %p4977_p1 = scmp.eq.s32.totalorder %s5718_s27, 3  ;;  %s5523_s6 = smov [#allocation18]  }
0x17c3   : > { %s4206_s7 = sshll.u32 %s5523_s6, 4  ;;  %s4207_s7 = int_to_ptr.vmem [resolvable:$true] %s4206_s7 }
0x17c4   : > { %s5403_s18 = scalar_lea.vmem %s4207_s7, 32  ;;  %p5410_p10 = scmp.lt.s32.totalorder %s4207_s7, %s4207_s7 }
0x17c5   : > { %p5404_p4 = scmp.ne.s32.totalorder %s4207_s7, %s5403_s18  ;;  %p5411_p11 = scmp.lt.s32.totalorder %s5403_s18, %s5403_s18 }
0x17c7   : > { %p5405_p8 = pnand %p5404_p4, %p4977_p1  ;;  %p5412_p12 = por %p5411_p11, %p5410_p10 }
0x17c9   : > { %p5406_p9 = pneg %p5405_p8 }
0x17cb   : > { %p5413_p0 = pnand %p5412_p12, %p5406_p9 }
0x17cd   : > { %5416 = shalt.err (!%p5413_p0)
}
0x17ce   : > { %s6494_s25 = sld [smem:[#allocation41_spill]] }
0x17d4   : > { %4942 = dma.vmem_to_hbm [thread:$0]  (%p4977_p1), %s4207_s7, 32, %s6494_s25, [#allocation5]  }
0x17d5   : > { %5472 = dma.done.wait (%p4977_p1), [#allocation5], 32  }
0x17d6   : > { %5474 = vsyncadd (%p4977_p1), [#allocation5], 4294967264 }
0x17d7 PF: > { %s37_s30 = sadd.s32 1, %s5497_s30   ;;  %s6495_s20 = sld [smem:[#allocation25_spill]] }
0x17d8   : > { %p34_p13 = scmp.ge.s32.totalorder %s37_s30, 6   ;;  %s6496_s27 = sld [smem:[#allocation28_spill]] }
0x17d9   : > { %s6497_s0 = sld [smem:[#allocation27_spill]]  ;;  %s6498_s25 = smov %s5481_s26 }
0x17da   : > { %s6500_s28 = smov %s5493_s29 }
0x17db   :  { %36 = sbr.rel (!%p34_p13) target bundleno = 26 (0x1a), region = 219 }
0x17dd   : > { %s6499_s26 = smov %s6495_s20 }
0x17df   : > { %s6501_s29 = smov %s6497_s0 }
0x17e0   :  { %4219 = vsyncpa [#allocation4], 1 }
0x17e1   :  { %4221 = vsyncpa [#allocation4 + $0x1], 1 }
0x17e2   :  { %4222 = vsyncpa [#allocation7], 1 }
0x17e3   :  { %4224 = vsyncpa [#allocation7 + $0x1], 1 }
0x17e4   :  { %4225 = vsyncpa [#allocation10], 1 }
0x17e5   :  { %4227 = vsyncpa [#allocation10 + $0x1], 1 }
0x17e6   :  { %4228 = vsyncpa [#allocation13], 1 }
0x17e7   :  { %4230 = vsyncpa [#allocation13 + $0x1], 1 }
0x17e8   :  { %4231 = vsyncpa [#allocation16], 1 }
0x17e9   :  { %4233 = vsyncpa [#allocation16 + $0x1], 1 }
0x17ea   :  { %4234 = vsyncpa [#allocation5], 1 }
0x17eb   :  { %4236 = vsyncpa [#allocation5 + $0x1], 1 }

</bundles_post_ra>
